<compile_context>
chip_gen: v6e
topology: v6e:2x2x1
jax: 0.10.0
libtpu: 0.0.40
codegen_flags: <defaults>
</compile_context>

<pallas_src>
import math

import numpy as np
import jax
import jax.numpy as jnp
from jax.experimental import pallas as pl
from jax.experimental.pallas import tpu as pltpu

# ----------------------------- config (small, ViT-like) ---------------------
B = 2            # batch
C = 3            # image channels
IMG = 16         # image size
P = 8            # patch size
NPATCH = (IMG // P) ** 2          # 4 patches
T = NPATCH + 1                    # 5 tokens (CLS + patches)
BT = B * T                        # 10 tokens total (batch folded on sublanes)
PD = C * P * P                    # patch feature dim = 192
H = 32           # hidden size
NH = 4           # attention heads
DH = H // NH     # head dim = 8
L = 2            # transformer layers
INTER = 64       # MLP intermediate size
NL = 3           # num_labels
EPS = 1e-12      # ViT layer_norm_eps
NHBT = NH * BT   # 40

# packed lane-dense output slab:
#   rows 0..BT-1, lanes [0,H)        -> sequence_output (per token)
#   rows 0..BT-1, lanes [H,H+2*NL)   -> [hard | soft] logits per token
#   everything else                   -> zero padding
# wrapper reads logits at the CLS rows (rows 0 and T).
OUT_ROWS = 16
OUT_LANES = 128

W_N = H          # narrow constant slab lane width (32)
W_W = 3 * H      # wide constant slab lane width (96)


# ----------------------------- constant-slab layout (static) -----------------
def _build_layout(items):
    layout, row = {}, 0
    for name, nr, nc in items:
        layout[name] = (row, nr, nc)
        row += ((nr + 7) // 8) * 8            # 8-sublane-align every item
    return layout, row


_N_ITEMS = [("pw", PD, H),         # patch projection weight
            ("add", BT, H),        # cls/pos/conv-bias additive constant
            ("vmask", NHBT, H)]    # head-block-diagonal 0/1 mask
for _l in range(L):
    _N_ITEMS += [(f"vec{_l}", 6, H),        # ln1_g, ln1_b, bo, ln2_g, ln2_b, bf2
                 (f"wo{_l}", H, H),
                 (f"wf2{_l}", INTER, H)]
_N_ITEMS += [("fvec", 3, H),                # lnf_g, lnf_b, heads bias (padded)
             ("whs", H, 2 * NL)]            # fused [hard | soft] head weights
LAYOUT_N, ROWS_N = _build_layout(_N_ITEMS)

_W_ITEMS = [("attn_bias", BT, NHBT)]        # batch-block-diag additive mask, per head block
for _l in range(L):
    _W_ITEMS += [(f"wqkv{_l}", H, 3 * H),   # fused (scaled-Q | K | V) weights
                 (f"wb{_l}", 2, 3 * H),     # row0: fused qkv bias, row1: bf1 (padded)
                 (f"wf1{_l}", H, INTER)]
LAYOUT_W, ROWS_W = _build_layout(_W_ITEMS)


# ----------------------------- in-kernel helpers -----------------------------
def _layernorm(x, g, b):
    # E[x^2]-E[x]^2 form: the two cross-lane reductions are independent.
    mu = jnp.mean(x, axis=-1, keepdims=True)
    ms = jnp.mean(x * x, axis=-1, keepdims=True)
    var = ms - mu * mu
    return (x - mu) * jax.lax.rsqrt(var + EPS) * g + b


def _erf(x):
    # Abramowitz & Stegun 7.1.26 (|err| < 1.5e-7); exp-only (EUP slot).
    ax = jnp.abs(x)
    t = 1.0 / (1.0 + 0.3275911 * ax)
    poly = ((((1.061405429 * t - 1.453152027) * t + 1.421413741) * t
             - 0.284496736) * t + 0.254829592) * t
    y = 1.0 - poly * jnp.exp(-ax * ax)
    return jnp.where(x >= 0.0, y, -y)


def _gelu(x):
    return 0.5 * x * (1.0 + _erf(x * (1.0 / math.sqrt(2.0))))


# ----------------------------- the kernel ------------------------------------
def vit_kernel(x_ref, sn_ref, sw_ref, out_ref):
    def ld_n(name):
        r, nr, nc = LAYOUT_N[name]
        return sn_ref[r:r + nr, 0:nc]

    def ld_w(name):
        r, nr, nc = LAYOUT_W[name]
        return sw_ref[r:r + nr, 0:nc]

    pw = ld_n("pw")                 # (PD, H)
    add_c = ld_n("add")             # (BT, H)   cls/pos/conv-bias constant
    vmask = ld_n("vmask")           # (NHBT, H) head-block-diagonal 0/1 mask
    attn_bias = ld_w("attn_bias")   # (BT, NHBT) 0 / -1e30 batch mask per head block

    # patch embedding + CLS + position embeddings in one matmul + one add
    # (CLS rows of x are zero; their embedding comes entirely from add_c).
    h = jnp.dot(x_ref[...], pw, preferred_element_type=jnp.float32) + add_c   # (BT,H)

    for l in range(L):
        vec = ld_n(f"vec{l}")
        wo = ld_n(f"wo{l}")
        wf2 = ld_n(f"wf2{l}")
        wqkv = ld_w(f"wqkv{l}")
        wb = ld_w(f"wb{l}")
        wf1 = ld_w(f"wf1{l}")

        ln1_g, ln1_b, bo = vec[0:1], vec[1:2], vec[2:3]
        ln2_g, ln2_b, bf2 = vec[3:4], vec[4:5], vec[5:6]
        bqkv = wb[0:1, :]                 # (1, 3H) — 1/sqrt(DH) already folded into Q part
        bf1 = wb[1:2, 0:INTER]            # (1, INTER)

        # ---- attention (all NH heads batched via head-block-diagonal K/V) ----
        x1 = _layernorm(h, ln1_g, ln1_b)
        qkv = jnp.dot(x1, wqkv, preferred_element_type=jnp.float32) + bqkv     # (BT, 3H)
        q = qkv[:, 0:H]                   # already scaled by 1/sqrt(DH)
        k = qkv[:, H:2 * H]
        v = qkv[:, 2 * H:3 * H]

        k_blk = jnp.concatenate([k] * NH, axis=0) * vmask                      # (NHBT, H)
        v_blk = jnp.concatenate([v] * NH, axis=0) * vmask                      # (NHBT, H)

        # scores: column block hd = Q_hd @ K_hd^T   (one MXU push for all heads)
        s = jax.lax.dot_general(q, k_blk, (((1,), (1,)), ((), ())),
                                preferred_element_type=jnp.float32) + attn_bias  # (BT,NHBT)
        s = s - jnp.max(s, axis=-1, keepdims=True)   # shared per-row max: valid per block
        pr = jnp.exp(s)
        num = jnp.dot(pr, v_blk, preferred_element_type=jnp.float32)           # (BT, H)
        den = jnp.dot(pr, vmask, preferred_element_type=jnp.float32)           # per-head sums
        attn = num / den                                                        # head-concat output

        h = h + jnp.dot(attn, wo, preferred_element_type=jnp.float32) + bo      # residual 1

        # ---- MLP ----
        x2 = _layernorm(h, ln2_g, ln2_b)
        m = _gelu(jnp.dot(x2, wf1, preferred_element_type=jnp.float32) + bf1)
        h = h + jnp.dot(m, wf2, preferred_element_type=jnp.float32) + bf2        # residual 2

    # ---- final layernorm -> sequence_output; fused heads on all rows ----
    fvec = ld_n("fvec")
    seq = _layernorm(h, fvec[0:1], fvec[1:2])                                    # (BT, H)
    whs = ld_n("whs")                                                            # (H, 2NL)
    heads = jnp.dot(seq, whs, preferred_element_type=jnp.float32) + fvec[2:3, 0:2 * NL]

    # ---- single lane-dense (16,128) slab, one unmasked store ----
    lane_pad = jnp.zeros((BT, OUT_LANES - H - 2 * NL), jnp.float32)
    top = jnp.concatenate([seq, heads, lane_pad], axis=1)                        # (BT, 128)
    bottom = jnp.zeros((OUT_ROWS - BT, OUT_LANES), jnp.float32)
    out_ref[...] = jnp.concatenate([top, bottom], axis=0)


# ----------------------------- host-side packing (one-time) ------------------
def _pack_slab(layout, rows, width, arrays):
    slab = np.zeros((rows, width), np.float32)
    for name, (r, nr, nc) in layout.items():
        a = np.asarray(arrays[name], np.float32)
        assert a.shape == (nr, nc), (name, a.shape, (nr, nc))
        slab[r:r + nr, :nc] = a
    return jnp.asarray(slab)


def prepare_params(params):
    """One-time: fuse weights + bake constants into two packed slabs."""
    p = {k: np.asarray(v, np.float32) for k, v in params.items()}
    scale = 1.0 / math.sqrt(DH)

    n_arr, w_arr = {}, {}
    n_arr["pw"] = p["patch_w"]                                        # (PD, H)

    # additive constant: CLS rows get cls_tok + pos[0] (no conv bias),
    # patch rows get conv bias + pos[1+i].
    pos = np.tile(p["pos_emb"], (B, 1))                               # (BT, H)
    is_cls = (np.arange(BT) % T == 0)[:, None]
    n_arr["add"] = pos + np.where(is_cls, p["cls_tok"], p["patch_b"])

    # head-block-diagonal 0/1 mask: row r (head r//BT) <-> col c (head c//DH)
    rr = np.arange(NHBT)[:, None] // BT
    cc = np.arange(H)[None, :] // DH
    n_arr["vmask"] = (rr == cc).astype(np.float32)                    # (NHBT, H)

    # batch-block-diagonal additive mask in the (BT, NH*BT) score layout
    qb = np.arange(BT)[:, None] // T
    kb = (np.arange(NHBT)[None, :] % BT) // T
    w_arr["attn_bias"] = np.where(qb == kb, 0.0, -1e30).astype(np.float32)

    for l in range(L):
        n_arr[f"vec{l}"] = np.stack([p["ln1_g"][l], p["ln1_b"][l], p["bo"][l],
                                     p["ln2_g"][l], p["ln2_b"][l], p["bf2"][l]], axis=0)
        n_arr[f"wo{l}"] = p["wo"][l]
        n_arr[f"wf2{l}"] = p["wf2"][l]

        w_arr[f"wqkv{l}"] = np.concatenate(
            [p["wq"][l] * scale, p["wk"][l], p["wv"][l]], axis=-1)    # (H, 3H)
        wb = np.zeros((2, 3 * H), np.float32)
        wb[0, :] = np.concatenate([p["bq"][l] * scale, p["bk"][l], p["bv"][l]], axis=-1)
        wb[1, :INTER] = p["bf1"][l]
        w_arr[f"wb{l}"] = wb
        w_arr[f"wf1{l}"] = p["wf1"][l]

    fvec = np.zeros((3, H), np.float32)
    fvec[0] = p["lnf_g"][0]
    fvec[1] = p["lnf_b"][0]
    fvec[2, :2 * NL] = np.concatenate([p["b_hard"][0], p["b_soft"][0]], axis=-1)
    n_arr["fvec"] = fvec
    n_arr["whs"] = np.concatenate([p["w_hard"], p["w_soft"]], axis=-1)  # (H, 2NL)

    return {"slab_n": _pack_slab(LAYOUT_N, ROWS_N, W_N, n_arr),
            "slab_w": _pack_slab(LAYOUT_W, ROWS_W, W_W, w_arr)}


# ----------------------------- forward wrapper --------------------------------
def vit_multitask_forward(pixel_values, prepared):
    # im2col: NCHW -> (B, NPATCH, C*P*P) in (c, ph, pw) order (Conv2d flattening),
    # then a zero row at each CLS position so the kernel needs no token concat.
    xp = pixel_values.reshape(B, C, IMG // P, P, IMG // P, P)
    xp = xp.transpose(0, 2, 4, 1, 3, 5).reshape(B, NPATCH, PD)
    xp = jnp.pad(xp, ((0, 0), (1, 0), (0, 0))).reshape(BT, PD).astype(jnp.float32)

    slab = pl.pallas_call(
        vit_kernel,
        out_shape=jax.ShapeDtypeStruct((OUT_ROWS, OUT_LANES), jnp.float32),
        grid=(1,),
        in_specs=[
            pl.BlockSpec((BT, PD), lambda i: (0, 0)),
            pl.BlockSpec((ROWS_N, W_N), lambda i: (0, 0)),
            pl.BlockSpec((ROWS_W, W_W), lambda i: (0, 0)),
        ],
        out_specs=pl.BlockSpec((OUT_ROWS, OUT_LANES), lambda i: (0, 0)),
        compiler_params=pltpu.CompilerParams(dimension_semantics=("arbitrary",)),
    )(xp, prepared["slab_n"], prepared["slab_w"])

    seq = slab[:BT, :H].reshape(B, T, H)
    cls_heads = slab[0:BT:T, H:H + 2 * NL]          # CLS rows 0 and T -> (B, 2*NL)
    return {
        "last_hidden_state": seq,
        "logits": cls_heads[:, :NL],
        "soft_logits": cls_heads[:, NL:],
    }


# ----------------------------- deterministic params --------------------------
def make_params(key):
    keys = iter(jax.random.split(key, 40))

    def nrm(shape, scale=0.02):
        return scale * jax.random.normal(next(keys), shape, jnp.float32)

    return {
        "patch_w": nrm((PD, H)),
        "patch_b": jnp.zeros((1, H), jnp.float32),
        "cls_tok": nrm((1, H)),
        "pos_emb": nrm((T, H)),
        "ln1_g": jnp.ones((L, H), jnp.float32),
        "ln1_b": jnp.zeros((L, H), jnp.float32),
        "wq": nrm((L, H, H)), "bq": jnp.zeros((L, H), jnp.float32),
        "wk": nrm((L, H, H)), "bk": jnp.zeros((L, H), jnp.float32),
        "wv": nrm((L, H, H)), "bv": jnp.zeros((L, H), jnp.float32),
        "wo": nrm((L, H, H)), "bo": jnp.zeros((L, H), jnp.float32),
        "ln2_g": jnp.ones((L, H), jnp.float32),
        "ln2_b": jnp.zeros((L, H), jnp.float32),
        "wf1": nrm((L, H, INTER)), "bf1": jnp.zeros((L, INTER), jnp.float32),
        "wf2": nrm((L, INTER, H)), "bf2": jnp.zeros((L, H), jnp.float32),
        "lnf_g": jnp.ones((1, H), jnp.float32),
        "lnf_b": jnp.zeros((1, H), jnp.float32),
        "w_hard": nrm((H, NL)), "b_hard": jnp.zeros((1, NL), jnp.float32),
        "w_soft": nrm((H, NL)), "b_soft": jnp.zeros((1, NL), jnp.float32),
    }


# ----------------------------- main -------------------------------------------
if __name__ == "__main__":
    key = jax.random.PRNGKey(0)
    k_x, k_p = jax.random.split(key)
    pixel_values = jax.random.normal(k_x, (B, C, IMG, IMG), jnp.float32)  # NCHW
    params = make_params(k_p)

    prepared = prepare_params(params)              # one-time, outside the hot path
    fwd = jax.jit(vit_multitask_forward)
    out = fwd(pixel_values, prepared)
    jax.block_until_ready(out)

    assert out["last_hidden_state"].shape == (B, T, H)
    assert out["logits"].shape == (B, NL)
    assert out["soft_logits"].shape == (B, NL)
    print("KERNEL_OK")
</pallas_src>

<mosaic_0001>
module attributes {stable_mosaic.version = 11 : i64} {
  func.func @vit_kernel(%arg0: i32, %arg1: memref<10x192xf32, #tpu.memory_space<vmem>>, %arg2: memref<496x32xf32, #tpu.memory_space<vmem>>, %arg3: memref<160x96xf32, #tpu.memory_space<vmem>>, %arg4: memref<16x128xf32, #tpu.memory_space<vmem>>) attributes {dimension_semantics = [#tpu.dimension_semantics<arbitrary>], iteration_bounds = array<i64: 1>, scalar_prefetch = 0 : i64, scratch_operands = 0 : i64, tpu.core_type = #tpu.core_type<tc>, window_params = [{pipeline_mode = #tpu.pipeline_mode<synchronous>, transform_indices = @transform_0, window_bounds = array<i64: 10, 192>}, {pipeline_mode = #tpu.pipeline_mode<synchronous>, transform_indices = @transform_1, window_bounds = array<i64: 496, 32>}, {pipeline_mode = #tpu.pipeline_mode<synchronous>, transform_indices = @transform_2, window_bounds = array<i64: 160, 96>}, {pipeline_mode = #tpu.pipeline_mode<synchronous>, transform_indices = @transform_3, window_bounds = array<i64: 16, 128>}]} {
    %c0 = arith.constant 0 : index
    %c0_0 = arith.constant 0 : index
    %0 = vector.load %arg2[%c0, %c0_0] : memref<496x32xf32, #tpu.memory_space<vmem>>, vector<192x32xf32>
    %c192 = arith.constant 192 : index
    %c0_1 = arith.constant 0 : index
    %1 = vector.load %arg2[%c192, %c0_1] : memref<496x32xf32, #tpu.memory_space<vmem>>, vector<10x32xf32>
    %c208 = arith.constant 208 : index
    %c0_2 = arith.constant 0 : index
    %2 = vector.load %arg2[%c208, %c0_2] : memref<496x32xf32, #tpu.memory_space<vmem>>, vector<40x32xf32>
    %c0_3 = arith.constant 0 : index
    %c0_4 = arith.constant 0 : index
    %3 = vector.load %arg3[%c0_3, %c0_4] : memref<160x96xf32, #tpu.memory_space<vmem>>, vector<10x40xf32>
    %c0_5 = arith.constant 0 : index
    %c0_6 = arith.constant 0 : index
    %4 = vector.load %arg1[%c0_5, %c0_6] : memref<10x192xf32, #tpu.memory_space<vmem>>, vector<10x192xf32>
    %cst = arith.constant dense<0.000000e+00> : vector<10x32xf32>
    %5 = tpu.matmul %4, %0, %cst {dimension_numbers = #tpu.dot_dimension_numbers<[1], [0], [0], [1], [0, 0, 1, 1], [], []>} : vector<10x192xf32>, vector<192x32xf32>, vector<10x32xf32> -> vector<10x32xf32>
    %6 = arith.addf %5, %1 : vector<10x32xf32>
    %c248 = arith.constant 248 : index
    %c0_7 = arith.constant 0 : index
    %7 = vector.load %arg2[%c248, %c0_7] : memref<496x32xf32, #tpu.memory_space<vmem>>, vector<6x32xf32>
    %c256 = arith.constant 256 : index
    %c0_8 = arith.constant 0 : index
    %8 = vector.load %arg2[%c256, %c0_8] : memref<496x32xf32, #tpu.memory_space<vmem>>, vector<32x32xf32>
    %c288 = arith.constant 288 : index
    %c0_9 = arith.constant 0 : index
    %9 = vector.load %arg2[%c288, %c0_9] : memref<496x32xf32, #tpu.memory_space<vmem>>, vector<64x32xf32>
    %c16 = arith.constant 16 : index
    %c0_10 = arith.constant 0 : index
    %10 = vector.load %arg3[%c16, %c0_10] : memref<160x96xf32, #tpu.memory_space<vmem>>, vector<32x96xf32>
    %c48 = arith.constant 48 : index
    %c0_11 = arith.constant 0 : index
    %11 = vector.load %arg3[%c48, %c0_11] : memref<160x96xf32, #tpu.memory_space<vmem>>, vector<2x96xf32>
    %c56 = arith.constant 56 : index
    %c0_12 = arith.constant 0 : index
    %12 = vector.load %arg3[%c56, %c0_12] : memref<160x96xf32, #tpu.memory_space<vmem>>, vector<32x64xf32>
    %13 = vector.extract_strided_slice %7 {offsets = [0, 0], sizes = [1, 32], strides = [1, 1]} : vector<6x32xf32> to vector<1x32xf32>
    %14 = vector.extract_strided_slice %7 {offsets = [1, 0], sizes = [1, 32], strides = [1, 1]} : vector<6x32xf32> to vector<1x32xf32>
    %15 = vector.extract_strided_slice %7 {offsets = [2, 0], sizes = [1, 32], strides = [1, 1]} : vector<6x32xf32> to vector<1x32xf32>
    %16 = vector.extract_strided_slice %7 {offsets = [3, 0], sizes = [1, 32], strides = [1, 1]} : vector<6x32xf32> to vector<1x32xf32>
    %17 = vector.extract_strided_slice %7 {offsets = [4, 0], sizes = [1, 32], strides = [1, 1]} : vector<6x32xf32> to vector<1x32xf32>
    %18 = vector.extract_strided_slice %7 {offsets = [5, 0], sizes = [1, 32], strides = [1, 1]} : vector<6x32xf32> to vector<1x32xf32>
    %19 = vector.extract_strided_slice %11 {offsets = [0, 0], sizes = [1, 96], strides = [1, 1]} : vector<2x96xf32> to vector<1x96xf32>
    %20 = vector.extract_strided_slice %11 {offsets = [1, 0], sizes = [1, 64], strides = [1, 1]} : vector<2x96xf32> to vector<1x64xf32>
    %cst_13 = arith.constant dense<0.000000e+00> : vector<10xf32>
    %21 = vector.multi_reduction <add>, %6, %cst_13 [1] : vector<10x32xf32> to vector<10xf32>
    %22 = vector.shape_cast %21 : vector<10xf32> to vector<10x1xf32>
    %cst_14 = arith.constant 3.200000e+01 : f32
    %23 = vector.broadcast %cst_14 : f32 to vector<10x1xf32>
    %24 = arith.divf %22, %23 : vector<10x1xf32>
    %25 = arith.mulf %6, %6 : vector<10x32xf32>
    %cst_15 = arith.constant dense<0.000000e+00> : vector<10xf32>
    %26 = vector.multi_reduction <add>, %25, %cst_15 [1] : vector<10x32xf32> to vector<10xf32>
    %27 = vector.shape_cast %26 : vector<10xf32> to vector<10x1xf32>
    %cst_16 = arith.constant 3.200000e+01 : f32
    %28 = vector.broadcast %cst_16 : f32 to vector<10x1xf32>
    %29 = arith.divf %27, %28 : vector<10x1xf32>
    %30 = arith.mulf %24, %24 : vector<10x1xf32>
    %31 = arith.subf %29, %30 : vector<10x1xf32>
    %32 = vector.broadcast %24 : vector<10x1xf32> to vector<10x32xf32>
    %33 = arith.subf %6, %32 : vector<10x32xf32>
    %cst_17 = arith.constant 9.99999996E-13 : f32
    %34 = vector.broadcast %cst_17 : f32 to vector<10x1xf32>
    %35 = arith.addf %31, %34 : vector<10x1xf32>
    %36 = math.rsqrt %35 : vector<10x1xf32>
    %37 = vector.broadcast %36 : vector<10x1xf32> to vector<10x32xf32>
    %38 = arith.mulf %33, %37 : vector<10x32xf32>
    %39 = vector.broadcast %13 : vector<1x32xf32> to vector<10x32xf32>
    %40 = arith.mulf %38, %39 : vector<10x32xf32>
    %41 = vector.broadcast %14 : vector<1x32xf32> to vector<10x32xf32>
    %42 = arith.addf %40, %41 : vector<10x32xf32>
    %cst_18 = arith.constant dense<0.000000e+00> : vector<10x96xf32>
    %43 = tpu.matmul %42, %10, %cst_18 {dimension_numbers = #tpu.dot_dimension_numbers<[1], [0], [0], [1], [0, 0, 1, 1], [], []>} : vector<10x32xf32>, vector<32x96xf32>, vector<10x96xf32> -> vector<10x96xf32>
    %44 = vector.broadcast %19 : vector<1x96xf32> to vector<10x96xf32>
    %45 = arith.addf %43, %44 : vector<10x96xf32>
    %46 = vector.extract_strided_slice %45 {offsets = [0, 0], sizes = [10, 32], strides = [1, 1]} : vector<10x96xf32> to vector<10x32xf32>
    %47 = vector.extract_strided_slice %45 {offsets = [0, 32], sizes = [10, 32], strides = [1, 1]} : vector<10x96xf32> to vector<10x32xf32>
    %48 = vector.extract_strided_slice %45 {offsets = [0, 64], sizes = [10, 32], strides = [1, 1]} : vector<10x96xf32> to vector<10x32xf32>
    %49 = tpu.concatenate %47, %47, %47, %47 in 0 : vector<10x32xf32>, vector<10x32xf32>, vector<10x32xf32>, vector<10x32xf32> -> vector<40x32xf32>
    %50 = arith.mulf %49, %2 : vector<40x32xf32>
    %51 = tpu.concatenate %48, %48, %48, %48 in 0 : vector<10x32xf32>, vector<10x32xf32>, vector<10x32xf32>, vector<10x32xf32> -> vector<40x32xf32>
    %52 = arith.mulf %51, %2 : vector<40x32xf32>
    %cst_19 = arith.constant dense<0.000000e+00> : vector<10x40xf32>
    %53 = tpu.matmul %46, %50, %cst_19 {dimension_numbers = #tpu.dot_dimension_numbers<[1], [1], [0], [0], [0, 0, 1, 0], [], []>} : vector<10x32xf32>, vector<40x32xf32>, vector<10x40xf32> -> vector<10x40xf32>
    %54 = arith.addf %53, %3 : vector<10x40xf32>
    %cst_20 = arith.constant dense<0xFF800000> : vector<10xf32>
    %55 = vector.multi_reduction <maximumf>, %54, %cst_20 [1] : vector<10x40xf32> to vector<10xf32>
    %56 = vector.shape_cast %55 : vector<10xf32> to vector<10x1xf32>
    %57 = vector.broadcast %56 : vector<10x1xf32> to vector<10x40xf32>
    %58 = arith.subf %54, %57 : vector<10x40xf32>
    %59 = math.exp %58 : vector<10x40xf32>
    %cst_21 = arith.constant dense<0.000000e+00> : vector<10x32xf32>
    %60 = tpu.matmul %59, %52, %cst_21 {dimension_numbers = #tpu.dot_dimension_numbers<[1], [0], [0], [1], [0, 0, 1, 1], [], []>} : vector<10x40xf32>, vector<40x32xf32>, vector<10x32xf32> -> vector<10x32xf32>
    %cst_22 = arith.constant dense<0.000000e+00> : vector<10x32xf32>
    %61 = tpu.matmul %59, %2, %cst_22 {dimension_numbers = #tpu.dot_dimension_numbers<[1], [0], [0], [1], [0, 0, 1, 1], [], []>} : vector<10x40xf32>, vector<40x32xf32>, vector<10x32xf32> -> vector<10x32xf32>
    %62 = arith.divf %60, %61 : vector<10x32xf32>
    %cst_23 = arith.constant dense<0.000000e+00> : vector<10x32xf32>
    %63 = tpu.matmul %62, %8, %cst_23 {dimension_numbers = #tpu.dot_dimension_numbers<[1], [0], [0], [1], [0, 0, 1, 1], [], []>} : vector<10x32xf32>, vector<32x32xf32>, vector<10x32xf32> -> vector<10x32xf32>
    %64 = arith.addf %6, %63 : vector<10x32xf32>
    %65 = vector.broadcast %15 : vector<1x32xf32> to vector<10x32xf32>
    %66 = arith.addf %64, %65 : vector<10x32xf32>
    %cst_24 = arith.constant dense<0.000000e+00> : vector<10xf32>
    %67 = vector.multi_reduction <add>, %66, %cst_24 [1] : vector<10x32xf32> to vector<10xf32>
    %68 = vector.shape_cast %67 : vector<10xf32> to vector<10x1xf32>
    %cst_25 = arith.constant 3.200000e+01 : f32
    %69 = vector.broadcast %cst_25 : f32 to vector<10x1xf32>
    %70 = arith.divf %68, %69 : vector<10x1xf32>
    %71 = arith.mulf %66, %66 : vector<10x32xf32>
    %cst_26 = arith.constant dense<0.000000e+00> : vector<10xf32>
    %72 = vector.multi_reduction <add>, %71, %cst_26 [1] : vector<10x32xf32> to vector<10xf32>
    %73 = vector.shape_cast %72 : vector<10xf32> to vector<10x1xf32>
    %cst_27 = arith.constant 3.200000e+01 : f32
    %74 = vector.broadcast %cst_27 : f32 to vector<10x1xf32>
    %75 = arith.divf %73, %74 : vector<10x1xf32>
    %76 = arith.mulf %70, %70 : vector<10x1xf32>
    %77 = arith.subf %75, %76 : vector<10x1xf32>
    %78 = vector.broadcast %70 : vector<10x1xf32> to vector<10x32xf32>
    %79 = arith.subf %66, %78 : vector<10x32xf32>
    %cst_28 = arith.constant 9.99999996E-13 : f32
    %80 = vector.broadcast %cst_28 : f32 to vector<10x1xf32>
    %81 = arith.addf %77, %80 : vector<10x1xf32>
    %82 = math.rsqrt %81 : vector<10x1xf32>
    %83 = vector.broadcast %82 : vector<10x1xf32> to vector<10x32xf32>
    %84 = arith.mulf %79, %83 : vector<10x32xf32>
    %85 = vector.broadcast %16 : vector<1x32xf32> to vector<10x32xf32>
    %86 = arith.mulf %84, %85 : vector<10x32xf32>
    %87 = vector.broadcast %17 : vector<1x32xf32> to vector<10x32xf32>
    %88 = arith.addf %86, %87 : vector<10x32xf32>
    %cst_29 = arith.constant dense<0.000000e+00> : vector<10x64xf32>
    %89 = tpu.matmul %88, %12, %cst_29 {dimension_numbers = #tpu.dot_dimension_numbers<[1], [0], [0], [1], [0, 0, 1, 1], [], []>} : vector<10x32xf32>, vector<32x64xf32>, vector<10x64xf32> -> vector<10x64xf32>
    %90 = vector.broadcast %20 : vector<1x64xf32> to vector<10x64xf32>
    %91 = arith.addf %89, %90 : vector<10x64xf32>
    %cst_30 = arith.constant 5.000000e-01 : f32
    %92 = vector.broadcast %cst_30 : f32 to vector<10x64xf32>
    %93 = arith.mulf %92, %91 : vector<10x64xf32>
    %cst_31 = arith.constant 0.707106769 : f32
    %94 = vector.broadcast %cst_31 : f32 to vector<10x64xf32>
    %95 = arith.mulf %91, %94 : vector<10x64xf32>
    %96 = math.absf %95 : vector<10x64xf32>
    %cst_32 = arith.constant 0.327591091 : f32
    %97 = vector.broadcast %cst_32 : f32 to vector<10x64xf32>
    %98 = arith.mulf %97, %96 : vector<10x64xf32>
    %cst_33 = arith.constant 1.000000e+00 : f32
    %99 = vector.broadcast %cst_33 : f32 to vector<10x64xf32>
    %100 = arith.addf %99, %98 : vector<10x64xf32>
    %cst_34 = arith.constant 1.000000e+00 : f32
    %101 = vector.broadcast %cst_34 : f32 to vector<10x64xf32>
    %102 = arith.divf %101, %100 : vector<10x64xf32>
    %cst_35 = arith.constant 1.06140542 : f32
    %103 = vector.broadcast %cst_35 : f32 to vector<10x64xf32>
    %104 = arith.mulf %103, %102 : vector<10x64xf32>
    %cst_36 = arith.constant 1.45315206 : f32
    %105 = vector.broadcast %cst_36 : f32 to vector<10x64xf32>
    %106 = arith.subf %104, %105 : vector<10x64xf32>
    %107 = arith.mulf %106, %102 : vector<10x64xf32>
    %cst_37 = arith.constant 1.42141378 : f32
    %108 = vector.broadcast %cst_37 : f32 to vector<10x64xf32>
    %109 = arith.addf %107, %108 : vector<10x64xf32>
    %110 = arith.mulf %109, %102 : vector<10x64xf32>
    %cst_38 = arith.constant 0.284496725 : f32
    %111 = vector.broadcast %cst_38 : f32 to vector<10x64xf32>
    %112 = arith.subf %110, %111 : vector<10x64xf32>
    %113 = arith.mulf %112, %102 : vector<10x64xf32>
    %cst_39 = arith.constant 0.254829586 : f32
    %114 = vector.broadcast %cst_39 : f32 to vector<10x64xf32>
    %115 = arith.addf %113, %114 : vector<10x64xf32>
    %116 = arith.mulf %115, %102 : vector<10x64xf32>
    %cst_40 = arith.constant 0.000000e+00 : f32
    %117 = vector.broadcast %cst_40 : f32 to vector<10x64xf32>
    %118 = arith.subf %117, %96 : vector<10x64xf32>
    %119 = arith.mulf %118, %96 : vector<10x64xf32>
    %120 = math.exp %119 : vector<10x64xf32>
    %121 = arith.mulf %116, %120 : vector<10x64xf32>
    %cst_41 = arith.constant 1.000000e+00 : f32
    %122 = vector.broadcast %cst_41 : f32 to vector<10x64xf32>
    %123 = arith.subf %122, %121 : vector<10x64xf32>
    %cst_42 = arith.constant 0.000000e+00 : f32
    %124 = vector.broadcast %cst_42 : f32 to vector<10x64xf32>
    %125 = arith.cmpf oge, %95, %124 : vector<10x64xf32>
    %cst_43 = arith.constant 0.000000e+00 : f32
    %126 = vector.broadcast %cst_43 : f32 to vector<10x64xf32>
    %127 = arith.subf %126, %123 : vector<10x64xf32>
    %128 = arith.select %125, %123, %127 : vector<10x64xi1>, vector<10x64xf32>
    %cst_44 = arith.constant 1.000000e+00 : f32
    %129 = vector.broadcast %cst_44 : f32 to vector<10x64xf32>
    %130 = arith.addf %129, %128 : vector<10x64xf32>
    %131 = arith.mulf %93, %130 : vector<10x64xf32>
    %cst_45 = arith.constant dense<0.000000e+00> : vector<10x32xf32>
    %132 = tpu.matmul %131, %9, %cst_45 {dimension_numbers = #tpu.dot_dimension_numbers<[1], [0], [0], [1], [0, 0, 1, 1], [], []>} : vector<10x64xf32>, vector<64x32xf32>, vector<10x32xf32> -> vector<10x32xf32>
    %133 = arith.addf %66, %132 : vector<10x32xf32>
    %134 = vector.broadcast %18 : vector<1x32xf32> to vector<10x32xf32>
    %135 = arith.addf %133, %134 : vector<10x32xf32>
    %c352 = arith.constant 352 : index
    %c0_46 = arith.constant 0 : index
    %136 = vector.load %arg2[%c352, %c0_46] : memref<496x32xf32, #tpu.memory_space<vmem>>, vector<6x32xf32>
    %c360 = arith.constant 360 : index
    %c0_47 = arith.constant 0 : index
    %137 = vector.load %arg2[%c360, %c0_47] : memref<496x32xf32, #tpu.memory_space<vmem>>, vector<32x32xf32>
    %c392 = arith.constant 392 : index
    %c0_48 = arith.constant 0 : index
    %138 = vector.load %arg2[%c392, %c0_48] : memref<496x32xf32, #tpu.memory_space<vmem>>, vector<64x32xf32>
    %c88 = arith.constant 88 : index
    %c0_49 = arith.constant 0 : index
    %139 = vector.load %arg3[%c88, %c0_49] : memref<160x96xf32, #tpu.memory_space<vmem>>, vector<32x96xf32>
    %c120 = arith.constant 120 : index
    %c0_50 = arith.constant 0 : index
    %140 = vector.load %arg3[%c120, %c0_50] : memref<160x96xf32, #tpu.memory_space<vmem>>, vector<2x96xf32>
    %c128 = arith.constant 128 : index
    %c0_51 = arith.constant 0 : index
    %141 = vector.load %arg3[%c128, %c0_51] : memref<160x96xf32, #tpu.memory_space<vmem>>, vector<32x64xf32>
    %142 = vector.extract_strided_slice %136 {offsets = [0, 0], sizes = [1, 32], strides = [1, 1]} : vector<6x32xf32> to vector<1x32xf32>
    %143 = vector.extract_strided_slice %136 {offsets = [1, 0], sizes = [1, 32], strides = [1, 1]} : vector<6x32xf32> to vector<1x32xf32>
    %144 = vector.extract_strided_slice %136 {offsets = [2, 0], sizes = [1, 32], strides = [1, 1]} : vector<6x32xf32> to vector<1x32xf32>
    %145 = vector.extract_strided_slice %136 {offsets = [3, 0], sizes = [1, 32], strides = [1, 1]} : vector<6x32xf32> to vector<1x32xf32>
    %146 = vector.extract_strided_slice %136 {offsets = [4, 0], sizes = [1, 32], strides = [1, 1]} : vector<6x32xf32> to vector<1x32xf32>
    %147 = vector.extract_strided_slice %136 {offsets = [5, 0], sizes = [1, 32], strides = [1, 1]} : vector<6x32xf32> to vector<1x32xf32>
    %148 = vector.extract_strided_slice %140 {offsets = [0, 0], sizes = [1, 96], strides = [1, 1]} : vector<2x96xf32> to vector<1x96xf32>
    %149 = vector.extract_strided_slice %140 {offsets = [1, 0], sizes = [1, 64], strides = [1, 1]} : vector<2x96xf32> to vector<1x64xf32>
    %cst_52 = arith.constant dense<0.000000e+00> : vector<10xf32>
    %150 = vector.multi_reduction <add>, %135, %cst_52 [1] : vector<10x32xf32> to vector<10xf32>
    %151 = vector.shape_cast %150 : vector<10xf32> to vector<10x1xf32>
    %cst_53 = arith.constant 3.200000e+01 : f32
    %152 = vector.broadcast %cst_53 : f32 to vector<10x1xf32>
    %153 = arith.divf %151, %152 : vector<10x1xf32>
    %154 = arith.mulf %135, %135 : vector<10x32xf32>
    %cst_54 = arith.constant dense<0.000000e+00> : vector<10xf32>
    %155 = vector.multi_reduction <add>, %154, %cst_54 [1] : vector<10x32xf32> to vector<10xf32>
    %156 = vector.shape_cast %155 : vector<10xf32> to vector<10x1xf32>
    %cst_55 = arith.constant 3.200000e+01 : f32
    %157 = vector.broadcast %cst_55 : f32 to vector<10x1xf32>
    %158 = arith.divf %156, %157 : vector<10x1xf32>
    %159 = arith.mulf %153, %153 : vector<10x1xf32>
    %160 = arith.subf %158, %159 : vector<10x1xf32>
    %161 = vector.broadcast %153 : vector<10x1xf32> to vector<10x32xf32>
    %162 = arith.subf %135, %161 : vector<10x32xf32>
    %cst_56 = arith.constant 9.99999996E-13 : f32
    %163 = vector.broadcast %cst_56 : f32 to vector<10x1xf32>
    %164 = arith.addf %160, %163 : vector<10x1xf32>
    %165 = math.rsqrt %164 : vector<10x1xf32>
    %166 = vector.broadcast %165 : vector<10x1xf32> to vector<10x32xf32>
    %167 = arith.mulf %162, %166 : vector<10x32xf32>
    %168 = vector.broadcast %142 : vector<1x32xf32> to vector<10x32xf32>
    %169 = arith.mulf %167, %168 : vector<10x32xf32>
    %170 = vector.broadcast %143 : vector<1x32xf32> to vector<10x32xf32>
    %171 = arith.addf %169, %170 : vector<10x32xf32>
    %cst_57 = arith.constant dense<0.000000e+00> : vector<10x96xf32>
    %172 = tpu.matmul %171, %139, %cst_57 {dimension_numbers = #tpu.dot_dimension_numbers<[1], [0], [0], [1], [0, 0, 1, 1], [], []>} : vector<10x32xf32>, vector<32x96xf32>, vector<10x96xf32> -> vector<10x96xf32>
    %173 = vector.broadcast %148 : vector<1x96xf32> to vector<10x96xf32>
    %174 = arith.addf %172, %173 : vector<10x96xf32>
    %175 = vector.extract_strided_slice %174 {offsets = [0, 0], sizes = [10, 32], strides = [1, 1]} : vector<10x96xf32> to vector<10x32xf32>
    %176 = vector.extract_strided_slice %174 {offsets = [0, 32], sizes = [10, 32], strides = [1, 1]} : vector<10x96xf32> to vector<10x32xf32>
    %177 = vector.extract_strided_slice %174 {offsets = [0, 64], sizes = [10, 32], strides = [1, 1]} : vector<10x96xf32> to vector<10x32xf32>
    %178 = tpu.concatenate %176, %176, %176, %176 in 0 : vector<10x32xf32>, vector<10x32xf32>, vector<10x32xf32>, vector<10x32xf32> -> vector<40x32xf32>
    %179 = arith.mulf %178, %2 : vector<40x32xf32>
    %180 = tpu.concatenate %177, %177, %177, %177 in 0 : vector<10x32xf32>, vector<10x32xf32>, vector<10x32xf32>, vector<10x32xf32> -> vector<40x32xf32>
    %181 = arith.mulf %180, %2 : vector<40x32xf32>
    %cst_58 = arith.constant dense<0.000000e+00> : vector<10x40xf32>
    %182 = tpu.matmul %175, %179, %cst_58 {dimension_numbers = #tpu.dot_dimension_numbers<[1], [1], [0], [0], [0, 0, 1, 0], [], []>} : vector<10x32xf32>, vector<40x32xf32>, vector<10x40xf32> -> vector<10x40xf32>
    %183 = arith.addf %182, %3 : vector<10x40xf32>
    %cst_59 = arith.constant dense<0xFF800000> : vector<10xf32>
    %184 = vector.multi_reduction <maximumf>, %183, %cst_59 [1] : vector<10x40xf32> to vector<10xf32>
    %185 = vector.shape_cast %184 : vector<10xf32> to vector<10x1xf32>
    %186 = vector.broadcast %185 : vector<10x1xf32> to vector<10x40xf32>
    %187 = arith.subf %183, %186 : vector<10x40xf32>
    %188 = math.exp %187 : vector<10x40xf32>
    %cst_60 = arith.constant dense<0.000000e+00> : vector<10x32xf32>
    %189 = tpu.matmul %188, %181, %cst_60 {dimension_numbers = #tpu.dot_dimension_numbers<[1], [0], [0], [1], [0, 0, 1, 1], [], []>} : vector<10x40xf32>, vector<40x32xf32>, vector<10x32xf32> -> vector<10x32xf32>
    %cst_61 = arith.constant dense<0.000000e+00> : vector<10x32xf32>
    %190 = tpu.matmul %188, %2, %cst_61 {dimension_numbers = #tpu.dot_dimension_numbers<[1], [0], [0], [1], [0, 0, 1, 1], [], []>} : vector<10x40xf32>, vector<40x32xf32>, vector<10x32xf32> -> vector<10x32xf32>
    %191 = arith.divf %189, %190 : vector<10x32xf32>
    %cst_62 = arith.constant dense<0.000000e+00> : vector<10x32xf32>
    %192 = tpu.matmul %191, %137, %cst_62 {dimension_numbers = #tpu.dot_dimension_numbers<[1], [0], [0], [1], [0, 0, 1, 1], [], []>} : vector<10x32xf32>, vector<32x32xf32>, vector<10x32xf32> -> vector<10x32xf32>
    %193 = arith.addf %135, %192 : vector<10x32xf32>
    %194 = vector.broadcast %144 : vector<1x32xf32> to vector<10x32xf32>
    %195 = arith.addf %193, %194 : vector<10x32xf32>
    %cst_63 = arith.constant dense<0.000000e+00> : vector<10xf32>
    %196 = vector.multi_reduction <add>, %195, %cst_63 [1] : vector<10x32xf32> to vector<10xf32>
    %197 = vector.shape_cast %196 : vector<10xf32> to vector<10x1xf32>
    %cst_64 = arith.constant 3.200000e+01 : f32
    %198 = vector.broadcast %cst_64 : f32 to vector<10x1xf32>
    %199 = arith.divf %197, %198 : vector<10x1xf32>
    %200 = arith.mulf %195, %195 : vector<10x32xf32>
    %cst_65 = arith.constant dense<0.000000e+00> : vector<10xf32>
    %201 = vector.multi_reduction <add>, %200, %cst_65 [1] : vector<10x32xf32> to vector<10xf32>
    %202 = vector.shape_cast %201 : vector<10xf32> to vector<10x1xf32>
    %cst_66 = arith.constant 3.200000e+01 : f32
    %203 = vector.broadcast %cst_66 : f32 to vector<10x1xf32>
    %204 = arith.divf %202, %203 : vector<10x1xf32>
    %205 = arith.mulf %199, %199 : vector<10x1xf32>
    %206 = arith.subf %204, %205 : vector<10x1xf32>
    %207 = vector.broadcast %199 : vector<10x1xf32> to vector<10x32xf32>
    %208 = arith.subf %195, %207 : vector<10x32xf32>
    %cst_67 = arith.constant 9.99999996E-13 : f32
    %209 = vector.broadcast %cst_67 : f32 to vector<10x1xf32>
    %210 = arith.addf %206, %209 : vector<10x1xf32>
    %211 = math.rsqrt %210 : vector<10x1xf32>
    %212 = vector.broadcast %211 : vector<10x1xf32> to vector<10x32xf32>
    %213 = arith.mulf %208, %212 : vector<10x32xf32>
    %214 = vector.broadcast %145 : vector<1x32xf32> to vector<10x32xf32>
    %215 = arith.mulf %213, %214 : vector<10x32xf32>
    %216 = vector.broadcast %146 : vector<1x32xf32> to vector<10x32xf32>
    %217 = arith.addf %215, %216 : vector<10x32xf32>
    %cst_68 = arith.constant dense<0.000000e+00> : vector<10x64xf32>
    %218 = tpu.matmul %217, %141, %cst_68 {dimension_numbers = #tpu.dot_dimension_numbers<[1], [0], [0], [1], [0, 0, 1, 1], [], []>} : vector<10x32xf32>, vector<32x64xf32>, vector<10x64xf32> -> vector<10x64xf32>
    %219 = vector.broadcast %149 : vector<1x64xf32> to vector<10x64xf32>
    %220 = arith.addf %218, %219 : vector<10x64xf32>
    %cst_69 = arith.constant 5.000000e-01 : f32
    %221 = vector.broadcast %cst_69 : f32 to vector<10x64xf32>
    %222 = arith.mulf %221, %220 : vector<10x64xf32>
    %cst_70 = arith.constant 0.707106769 : f32
    %223 = vector.broadcast %cst_70 : f32 to vector<10x64xf32>
    %224 = arith.mulf %220, %223 : vector<10x64xf32>
    %225 = math.absf %224 : vector<10x64xf32>
    %cst_71 = arith.constant 0.327591091 : f32
    %226 = vector.broadcast %cst_71 : f32 to vector<10x64xf32>
    %227 = arith.mulf %226, %225 : vector<10x64xf32>
    %cst_72 = arith.constant 1.000000e+00 : f32
    %228 = vector.broadcast %cst_72 : f32 to vector<10x64xf32>
    %229 = arith.addf %228, %227 : vector<10x64xf32>
    %cst_73 = arith.constant 1.000000e+00 : f32
    %230 = vector.broadcast %cst_73 : f32 to vector<10x64xf32>
    %231 = arith.divf %230, %229 : vector<10x64xf32>
    %cst_74 = arith.constant 1.06140542 : f32
    %232 = vector.broadcast %cst_74 : f32 to vector<10x64xf32>
    %233 = arith.mulf %232, %231 : vector<10x64xf32>
    %cst_75 = arith.constant 1.45315206 : f32
    %234 = vector.broadcast %cst_75 : f32 to vector<10x64xf32>
    %235 = arith.subf %233, %234 : vector<10x64xf32>
    %236 = arith.mulf %235, %231 : vector<10x64xf32>
    %cst_76 = arith.constant 1.42141378 : f32
    %237 = vector.broadcast %cst_76 : f32 to vector<10x64xf32>
    %238 = arith.addf %236, %237 : vector<10x64xf32>
    %239 = arith.mulf %238, %231 : vector<10x64xf32>
    %cst_77 = arith.constant 0.284496725 : f32
    %240 = vector.broadcast %cst_77 : f32 to vector<10x64xf32>
    %241 = arith.subf %239, %240 : vector<10x64xf32>
    %242 = arith.mulf %241, %231 : vector<10x64xf32>
    %cst_78 = arith.constant 0.254829586 : f32
    %243 = vector.broadcast %cst_78 : f32 to vector<10x64xf32>
    %244 = arith.addf %242, %243 : vector<10x64xf32>
    %245 = arith.mulf %244, %231 : vector<10x64xf32>
    %cst_79 = arith.constant 0.000000e+00 : f32
    %246 = vector.broadcast %cst_79 : f32 to vector<10x64xf32>
    %247 = arith.subf %246, %225 : vector<10x64xf32>
    %248 = arith.mulf %247, %225 : vector<10x64xf32>
    %249 = math.exp %248 : vector<10x64xf32>
    %250 = arith.mulf %245, %249 : vector<10x64xf32>
    %cst_80 = arith.constant 1.000000e+00 : f32
    %251 = vector.broadcast %cst_80 : f32 to vector<10x64xf32>
    %252 = arith.subf %251, %250 : vector<10x64xf32>
    %cst_81 = arith.constant 0.000000e+00 : f32
    %253 = vector.broadcast %cst_81 : f32 to vector<10x64xf32>
    %254 = arith.cmpf oge, %224, %253 : vector<10x64xf32>
    %cst_82 = arith.constant 0.000000e+00 : f32
    %255 = vector.broadcast %cst_82 : f32 to vector<10x64xf32>
    %256 = arith.subf %255, %252 : vector<10x64xf32>
    %257 = arith.select %254, %252, %256 : vector<10x64xi1>, vector<10x64xf32>
    %cst_83 = arith.constant 1.000000e+00 : f32
    %258 = vector.broadcast %cst_83 : f32 to vector<10x64xf32>
    %259 = arith.addf %258, %257 : vector<10x64xf32>
    %260 = arith.mulf %222, %259 : vector<10x64xf32>
    %cst_84 = arith.constant dense<0.000000e+00> : vector<10x32xf32>
    %261 = tpu.matmul %260, %138, %cst_84 {dimension_numbers = #tpu.dot_dimension_numbers<[1], [0], [0], [1], [0, 0, 1, 1], [], []>} : vector<10x64xf32>, vector<64x32xf32>, vector<10x32xf32> -> vector<10x32xf32>
    %262 = arith.addf %195, %261 : vector<10x32xf32>
    %263 = vector.broadcast %147 : vector<1x32xf32> to vector<10x32xf32>
    %264 = arith.addf %262, %263 : vector<10x32xf32>
    %c456 = arith.constant 456 : index
    %c0_85 = arith.constant 0 : index
    %265 = vector.load %arg2[%c456, %c0_85] : memref<496x32xf32, #tpu.memory_space<vmem>>, vector<3x32xf32>
    %266 = vector.extract_strided_slice %265 {offsets = [0, 0], sizes = [1, 32], strides = [1, 1]} : vector<3x32xf32> to vector<1x32xf32>
    %267 = vector.extract_strided_slice %265 {offsets = [1, 0], sizes = [1, 32], strides = [1, 1]} : vector<3x32xf32> to vector<1x32xf32>
    %cst_86 = arith.constant dense<0.000000e+00> : vector<10xf32>
    %268 = vector.multi_reduction <add>, %264, %cst_86 [1] : vector<10x32xf32> to vector<10xf32>
    %269 = vector.shape_cast %268 : vector<10xf32> to vector<10x1xf32>
    %cst_87 = arith.constant 3.200000e+01 : f32
    %270 = vector.broadcast %cst_87 : f32 to vector<10x1xf32>
    %271 = arith.divf %269, %270 : vector<10x1xf32>
    %272 = arith.mulf %264, %264 : vector<10x32xf32>
    %cst_88 = arith.constant dense<0.000000e+00> : vector<10xf32>
    %273 = vector.multi_reduction <add>, %272, %cst_88 [1] : vector<10x32xf32> to vector<10xf32>
    %274 = vector.shape_cast %273 : vector<10xf32> to vector<10x1xf32>
    %cst_89 = arith.constant 3.200000e+01 : f32
    %275 = vector.broadcast %cst_89 : f32 to vector<10x1xf32>
    %276 = arith.divf %274, %275 : vector<10x1xf32>
    %277 = arith.mulf %271, %271 : vector<10x1xf32>
    %278 = arith.subf %276, %277 : vector<10x1xf32>
    %279 = vector.broadcast %271 : vector<10x1xf32> to vector<10x32xf32>
    %280 = arith.subf %264, %279 : vector<10x32xf32>
    %cst_90 = arith.constant 9.99999996E-13 : f32
    %281 = vector.broadcast %cst_90 : f32 to vector<10x1xf32>
    %282 = arith.addf %278, %281 : vector<10x1xf32>
    %283 = math.rsqrt %282 : vector<10x1xf32>
    %284 = vector.broadcast %283 : vector<10x1xf32> to vector<10x32xf32>
    %285 = arith.mulf %280, %284 : vector<10x32xf32>
    %286 = vector.broadcast %266 : vector<1x32xf32> to vector<10x32xf32>
    %287 = arith.mulf %285, %286 : vector<10x32xf32>
    %288 = vector.broadcast %267 : vector<1x32xf32> to vector<10x32xf32>
    %289 = arith.addf %287, %288 : vector<10x32xf32>
    %c464 = arith.constant 464 : index
    %c0_91 = arith.constant 0 : index
    %290 = vector.load %arg2[%c464, %c0_91] : memref<496x32xf32, #tpu.memory_space<vmem>>, vector<32x6xf32>
    %cst_92 = arith.constant dense<0.000000e+00> : vector<10x6xf32>
    %291 = tpu.matmul %289, %290, %cst_92 {dimension_numbers = #tpu.dot_dimension_numbers<[1], [0], [0], [1], [0, 0, 1, 1], [], []>} : vector<10x32xf32>, vector<32x6xf32>, vector<10x6xf32> -> vector<10x6xf32>
    %292 = vector.extract_strided_slice %265 {offsets = [2, 0], sizes = [1, 6], strides = [1, 1]} : vector<3x32xf32> to vector<1x6xf32>
    %293 = vector.broadcast %292 : vector<1x6xf32> to vector<10x6xf32>
    %294 = arith.addf %291, %293 : vector<10x6xf32>
    %cst_93 = arith.constant 0.000000e+00 : f32
    %295 = vector.broadcast %cst_93 : f32 to vector<10x90xf32>
    %296 = tpu.concatenate %289, %294, %295 in 1 : vector<10x32xf32>, vector<10x6xf32>, vector<10x90xf32> -> vector<10x128xf32>
    %cst_94 = arith.constant 0.000000e+00 : f32
    %297 = vector.broadcast %cst_94 : f32 to vector<6x128xf32>
    %298 = tpu.concatenate %296, %297 in 0 : vector<10x128xf32>, vector<6x128xf32> -> vector<16x128xf32>
    %c0_95 = arith.constant 0 : index
    %c0_96 = arith.constant 0 : index
    %299 = vector.load %arg4[%c0_95, %c0_96] : memref<16x128xf32, #tpu.memory_space<vmem>>, vector<16x128xf32>
    tpu.vector_store %arg4[%c0_95, %c0_96], %298 {strides = array<i32>} : memref<16x128xf32, #tpu.memory_space<vmem>>, vector<16x128xf32>,
    return
  }
  func.func @transform_0(%arg0: i32) -> (i32, i32) {
    %c0_i32 = arith.constant 0 : i32
    %c0_i32_0 = arith.constant 0 : i32
    %c0_i32_1 = arith.constant 0 : i32
    return %c0_i32, %c0_i32_0 : i32, i32
  }
  func.func @transform_1(%arg0: i32) -> (i32, i32) {
    %c0_i32 = arith.constant 0 : i32
    %c0_i32_0 = arith.constant 0 : i32
    %c0_i32_1 = arith.constant 0 : i32
    return %c0_i32, %c0_i32_0 : i32, i32
  }
  func.func @transform_2(%arg0: i32) -> (i32, i32) {
    %c0_i32 = arith.constant 0 : i32
    %c0_i32_0 = arith.constant 0 : i32
    %c0_i32_1 = arith.constant 0 : i32
    return %c0_i32, %c0_i32_0 : i32, i32
  }
  func.func @transform_3(%arg0: i32) -> (i32, i32) {
    %c0_i32 = arith.constant 0 : i32
    %c0_i32_0 = arith.constant 0 : i32
    %c0_i32_1 = arith.constant 0 : i32
    return %c0_i32, %c0_i32_0 : i32, i32
  }
}

</mosaic_0001>

<bundles_post_ra>
// kernel: vit_multitask_forward.1
= control target key start
LH: loop header
LB: loop body
LE: loop exit
PB: predicated region body
PF: predicated region fallthrough
CT: control target
= control target key end

     0   :  { %v2399_v0 = vmov 0.0   ;;  %vm51_vm0 = vcmask 523264   ;;  %vm155_vm1 = vcmask 261120   ;;  %vm159_vm2 = vcmask 254976   ;;  %s2400_s29 = smov 32   ;;  %s2401_s13 = smov 96   ;;  %s3068_s1 = inlined_call_operand.vmem [shape: f32[496,32], index: 1, kind: input, shape index: {}]   ;;  %s3069_s0 = inlined_call_operand.vmem [shape: f32[10,192], index: 0, kind: input, shape index: {}]   ;;  %s3070_s2 = inlined_call_operand.vmem [shape: f32[160,96], index: 2, kind: input, shape index: {}]   ;;  %s3071_s3 = inlined_call_operand.vmem [shape: f32[16,128], index: 3, kind: output, shape index: {}]  }
   0x1   :  { %58 = vmatprep.subr.mxu0 %v2399_v0  ;;  %v29_v1 = vld [vmem:[%s3068_s1 + $0x78] sm:$0xff]  ;;  %v28_v2 = vld [vmem:[%s3068_s1 + $0x70] sm:$0xff]  ;;  %v27_v3 = vld [vmem:[%s3068_s1 + $0x68] sm:$0xff]  ;;  %vm287_vm3 = vcmask 1041408   ;;  %vm293_vm4 = vcmask 1043456   ;;  %vm299_vm5 = vcmask 1045504  }
   0x2   :  { %59 = vmatpush1.msra.mxu0 %v29_v1  ;;  %v26_v4 = vld [vmem:[%s3068_s1 + $0x60] sm:$0xff]  ;;  %v25_v5 = vld [vmem:[%s3068_s1 + $0x58] sm:$0xff]  ;;  %v24_v6 = vld [vmem:[%s3068_s1 + $0x50] sm:$0xff]  ;;  %v188_v1 = vlaneseq  ;;  %s2402_s14 = smov 64   ;;  %vm461_vm6 = vcmask 320512   ;;  %vm457_vm7 = vcmask 326656  }
   0x3   :  { %60 = vmatprep.subr.mxu0 %v2399_v0  ;;  %v48_v7 = vld [vmem:[%s3069_s0 + $0x8] sm:$0xff]  ;;  %v22_v9 = vld [vmem:[%s3068_s1 + $0x40] sm:$0xff]  ;;  %v21_v10 = vld [vmem:[%s3068_s1 + $0x38] sm:$0xff]  ;;  %vm1986_vm12 = vcmask 310272  }
   0x4   :  { %61 = vmatpush1.msra.mxu0 %v28_v2  ;;  %1996 = vmatprep.mubr.msk.f32.mxu0 %vm51_vm0, %v48_v7  ;;  %v23_v8 = vld [vmem:[%s3068_s1 + $0x48] sm:$0xff]  ;;  %v20_v11 = vld [vmem:[%s3068_s1 + $0x30] sm:$0xff]  ;;  %v18_v13 = vld [vmem:[%s3068_s1 + $0x20] sm:$0xff] }
   0x5   :  { %62 = vmatprep.subr.mxu0 %v2399_v0  ;;  %v19_v12 = vld [vmem:[%s3068_s1 + $0x28] sm:$0xff]  ;;  %v17_v14 = vld [vmem:[%s3068_s1 + $0x18] sm:$0xff]  ;;  %v16_v15 = vld [vmem:[%s3068_s1 + $0x10] sm:$0xff] }
   0x6   :  { %63 = vmatpush1.msra.mxu0 %v27_v3  ;;  %v15_v16 = vld [vmem:[%s3068_s1 + $0x8] sm:$0xff]  ;;  %v14_v17 = vld [vmem:[%s3068_s1] sm:$0xff]  ;;  %v37_v18 = vld [vmem:[%s3068_s1 + $0xb8] sm:$0xff]  ;;  %v2600_v3 = vshrl.u32 %v188_v1, 7 }
   0x7   :  { %64 = vmatprep.subr.mxu0 %v2399_v0  ;;  %v36_v19 = vld [vmem:[%s3068_s1 + $0xb0] sm:$0xff]  ;;  %v35_v20 = vld [vmem:[%s3068_s1 + $0xa8] sm:$0xff]  ;;  %v34_v21 = vld [vmem:[%s3068_s1 + $0xa0] sm:$0xff] }
   0x8   :  { %65 = vmatpush1.msra.mxu0 %v26_v4  ;;  %v33_v22 = vld [vmem:[%s3068_s1 + $0x98] sm:$0xff]  ;;  %v32_v23 = vld [vmem:[%s3068_s1 + $0x90] sm:$0xff]  ;;  %v31_v24 = vld [vmem:[%s3068_s1 + $0x88] sm:$0xff]  ;;  %v2603_v4 = vsub.s32 0, %v2600_v3 }
   0x9   :  { %66 = vmatprep.subr.mxu0 %v2399_v0  ;;  %v30_v25 = vld [vmem:[%s3068_s1 + $0x80] sm:$0xff]  ;;  %v50_v27 = vld [vmem:[%s3069_s0 + $0x18] sm:$0x3]  ;;  %v49_v28 = vld [vmem:[%s3069_s0 + $0x10] sm:$0x3] }
   0xa   :  { %67 = vmatpush1.msra.mxu0 %v25_v5  ;;  %v47_v26 = vld [vmem:[%s3069_s0] sm:$0xff]  ;;  %v39_v33 = vld [vmem:[%s3068_s1 + $0xc8] sm:$0x3]  ;;  %v147_v45 = vld [vmem:[%s3070_s2 + $0x18] sm:$0xff] }
   0xb   :  { %68 = vmatprep.subr.mxu0 %v2399_v0  ;;  %v38_v29 = vld [vmem:[%s3068_s1 + $0xc0] sm:$0xff]  ;;  %v149_v43 = vld [vmem:[%s3070_s2 + $0x28] sm:$0xff]  ;;  %v146_v46 = vld [vmem:[%s3070_s2 + $0x10] sm:$0xff] }
   0xc   :  { %69 = vmatpush1.msra.mxu0 %v24_v6  ;;  %v148_v44 = vld [vmem:[%s3070_s2 + $0x20] sm:$0xff]  ;;  %2150 = vmatprep.subr.mxu1 %v149_v43  ;;  %v2568_v47 = vld [vmem:[%s3068_s1 + $0xe8] sm:$0xff]  ;;  %v2573_v48 = vld [vmem:[%s3068_s1 + $0xf0] sm:$0xff]  ;;  %v2611_v6 = vsub.s32 1, %v2600_v3 }
   0xd   :  { %70 = vmatprep.subr.mxu0 %v2399_v0  ;;  %2151 = vmatpush3.msra.mxu1 %v149_v43  ;;  %v2582_v49 = vld [vmem:[%s3068_s1 + $0xe0] sm:$0xff]  ;;  %v2587_v50 = vld [vmem:[%s3068_s1 + $0xd0] sm:$0xff]  ;;  %v2596_v51 = vld [vmem:[%s3068_s1 + $0xd8] sm:$0xff] }
   0xe   :  { %71 = vmatpush1.msra.mxu0 %v23_v8  ;;  %2152 = vmatprep.subr.mxu1 %v148_v44  ;;  %v2608_v5 = vld [vmem:[%s3068_s1 + $0xf8] sm:$0x3f] }
   0xf   :  { %72 = vmatprep.subr.mxu0 %v2399_v0  ;;  %2153 = vmatpush3.msra.mxu1 %v148_v44  ;;  %v191_v8 = vrot.slane %v2608_v5, %v2603_v4 }
  0x10   :  { %73 = vmatpush1.msra.mxu0 %v22_v9  ;;  %2154 = vmatprep.subr.mxu1 %v147_v45 }
  0x11   :  { %74 = vmatprep.subr.mxu0 %v2399_v0  ;;  %2155 = vmatpush3.msra.mxu1 %v147_v45 }
  0x12   :  { %75 = vmatpush1.msra.mxu0 %v21_v10  ;;  %2156 = vmatprep.subr.mxu1 %v146_v46 }
  0x13   :  { %76 = vmatprep.subr.mxu0 %v2399_v0  ;;  %2157 = vmatpush3.msra.mxu1 %v146_v46 }
  0x14   :  { %77 = vmatpush1.msra.mxu0 %v20_v11  ;;  %v197_v11 = vrot.slane %v2608_v5, %v2611_v6 }
  0x15   :  { %78 = vmatprep.subr.mxu0 %v2399_v0 }
  0x16   :  { %79 = vmatpush1.msra.mxu0 %v19_v12 }
  0x17   :  { %80 = vmatprep.subr.mxu0 %v2399_v0 }
  0x18   :  { %81 = vmatpush1.msra.mxu0 %v18_v13 }
  0x19   :  { %82 = vmatprep.subr.mxu0 %v2399_v0 }
  0x1a   :  { %83 = vmatpush1.msra.mxu0 %v17_v14 }
  0x1b   :  { %84 = vmatprep.subr.mxu0 %v2399_v0 }
  0x1c   :  { %85 = vmatpush1.msra.mxu0 %v16_v15 }
  0x1d   :  { %86 = vmatprep.subr.mxu0 %v2399_v0 }
  0x1e   :  { %87 = vmatpush1.msra.mxu0 %v15_v16 }
  0x1f   :  { %88 = vmatprep.subr.mxu0 %v2399_v0 }
  0x20   :  { %89 = vmatpush1.msra.mxu0 %v14_v17 }
  0x21   :  { %106 = vmatprep.subr.mxu0 %v2399_v0 }
  0x22   :  { %107 = vmatpush2.msra.mxu0 %v37_v18 }
  0x23   :  { %108 = vmatprep.subr.mxu0 %v2399_v0 }
  0x24   :  { %109 = vmatpush2.msra.mxu0 %v36_v19  ;;  %v2624_v19 = vld [vmem:[%s3070_s2 + $0x30] sm:$0x3] }
  0x25   :  { %110 = vmatprep.subr.mxu0 %v2399_v0 }
  0x26   :  { %111 = vmatpush2.msra.mxu0 %v35_v20  ;;  %v203_v20 = vrot.slane %v2624_v19, %v2603_v4 }
  0x27   :  { %112 = vmatprep.subr.mxu0 %v2399_v0 }
  0x28   :  { %113 = vmatpush2.msra.mxu0 %v34_v21 }
  0x29   :  { %114 = vmatprep.subr.mxu0 %v2399_v0 }
  0x2a   :  { %115 = vmatpush2.msra.mxu0 %v33_v22 }
  0x2b   :  { %116 = vmatprep.subr.mxu0 %v2399_v0 }
  0x2c   :  { %117 = vmatpush2.msra.mxu0 %v32_v23 }
  0x2d   :  { %118 = vmatprep.subr.mxu0 %v2399_v0 }
  0x2e   :  { %119 = vmatpush2.msra.mxu0 %v31_v24 }
  0x2f   :  { %120 = vmatprep.subr.mxu0 %v2399_v0 }
  0x30   :  { %121 = vmatpush2.msra.mxu0 %v30_v25 }
  0x31   :  { %123 = vmatmul.mubr.f32.vlgmr.msra.gmra.mxu0 %v47_v26 }
  0x32   :  { %1997 = vmatprep.mubr.msk.f32.mxu0 %vm51_vm0, %v50_v27 }
  0x35   :  { %128 = vmatmul.mubr.f32.gmra.mxu0 %v49_v28 }
  0xf1   :  { %v124_v30 = vpop.f32.mrf.mxu0 }
  0xf2   :  { %v2536_v31 = vadd.f32 %v124_v30, %v38_v29 }
  0xf3   :  { %v126_v32 = vpop.f32.mrf.mxu0 }
  0xf4   :  { %v156_v34 = vsel %vm155_vm1, %v2536_v31, 0.0  ;;  %v166_v35 = vmul.f32 %v2536_v31, %v2536_v31 }
  0xf5   :  { %v129_v36 = vpop.f32.mrf.mxu0  ;;  %157 = vadd.xlane.f32.xlu0 %v156_v34 }
  0xf6   :  { %v2545_v37 = vadd.f32 %v129_v36, %v39_v33  ;;  %v168_v38 = vsel %vm155_vm1, %v166_v35, 0.0 }
  0xf7   :  { %v131_v39 = vpop.f32.mrf.mxu0  ;;  %169 = vadd.xlane.f32.xlu1 %v168_v38 }
  0xf8   :  { %v160_v40 = vsel %vm159_vm2, %v2545_v37, 0.0  ;;  %v167_v41 = vmul.f32 %v2545_v37, %v2545_v37 }
  0xf9   :  { %161 = vadd.xlane.f32.xlu0 %v160_v40 }
  0xfa   :  { %v171_v42 = vsel %vm159_vm2, %v167_v41, 0.0 }
  0xfb   :  { %172 = vadd.xlane.f32.xlu1 %v171_v42 }
 0x10c   :  { %319 = vrot.lane.b32.xlu1 %v2568_v47, %s2400_s29 }
 0x10f   :  { %321 = vrot.lane.b32.xlu0 %v2573_v48, %s2400_s29 }
 0x110   :  { %317 = vrot.lane.b32.xlu1 %v2582_v49, %s2400_s29 }
 0x113   :  { %313 = vrot.lane.b32.xlu0 %v2587_v50, %s2400_s29 }
 0x114   :  { %315 = vrot.lane.b32.xlu1 %v2596_v51, %s2400_s29 }
 0x17e   :  { %v158_v52 = vpop.xlane.xlu0 %157 }
 0x17f   :  { %v164_v53 = vmul.f32 0.03125, %v158_v52 }
 0x180   :  { %v170_v54 = vpop.xlane.xlu1 %169 }
 0x181   :  { %v176_v55 = vmul.f32 %v164_v53, %v164_v53  ;;  %v174_v56 = vmul.f32 0.03125, %v170_v54  ;;  %v180_v7 = vsub.f32 %v2536_v31, %v164_v53 }
 0x182   :  { %v162_v57 = vpop.xlane.xlu0 %161 }
 0x183   :  { %v178_v58 = vsub.f32 %v174_v56, %v176_v55  ;;  %v165_v59 = vmul.f32 0.03125, %v162_v57 }
 0x184   :  { %v173_v60 = vpop.xlane.xlu1 %172 }
 0x185   :  { %v182_v61 = vadd.f32 1e-12, %v178_v58  ;;  %v177_v62 = vmul.f32 %v165_v59, %v165_v59  ;;  %v175_v63 = vmul.f32 0.03125, %v173_v60  ;;  %v181_v12 = vsub.f32 %v2545_v37, %v165_v59 }
 0x186   :  { %v2644_v34 = vpop.permute.xlu0 %321 }
 0x187   :  { %2347 = vrsqrt.f32 %v182_v61  ;;  %v179_v0 = vsub.f32 %v175_v63, %v177_v62 }
 0x188   :  { %v2628_v21 = vpop.permute.xlu1 %319 }
 0x189   :  { %v183_v2 = vadd.f32 1e-12, %v179_v0 }
 0x18a   :  { %v2662_v46 = vpop.permute.xlu0 %313 }
 0x18b   :  { %2349 = vrsqrt.f32 %v183_v2 }
 0x18c   :  { %v2634_v26 = vpop.permute.xlu1 %317 }
 0x190   :  { %v2653_v43 = vpop.permute.xlu1 %315 }
 0x194   :  { %v2348_v9 = vpop.eup %2347 }
 0x195   :  { %v186_v10 = vmul.f32 %v2348_v9, %v180_v7 }
 0x197   :  { %v192_v13 = vmul.f32 %v191_v8, %v186_v10  ;;  %v2712_v10 = vld [vmem:[%s3070_s2 + $0x8] sm:$0x3] }
 0x198   :  { %v2350_v14 = vpop.eup %2349 }
 0x199   :  { %v187_v15 = vmul.f32 %v2350_v14, %v181_v12  ;;  %v198_v16 = vadd.f32 %v197_v11, %v192_v13  ;;  %v2717_v12 = vld [vmem:[%s3070_s2] sm:$0xff] }
 0x19b   :  { %v193_v17 = vmul.f32 %v191_v8, %v187_v15  ;;  %2158 = vmatprep.mubr.msk.f32.mxu1 %vm155_vm1, %v198_v16 }
 0x19d   :  { %v199_v18 = vadd.f32 %v197_v11, %v193_v17 }
 0x19f   :  { %2159 = vmatmul.mubr.msk.f32.vlgmr.msra.gmra.mxu1 %vm155_vm1, %v199_v18 }
 0x25f   :  { %v2160_v22 = vpop.f32.mrf.mxu1 }
 0x260   :  { %v2630_v23 = vadd.f32 %v2160_v22, %v203_v20 }
 0x261   :  { %v276_v24 = vpop.f32.mrf.mxu1 }
 0x262   :  { %v2632_v25 = vadd.f32 %v276_v24, %v203_v20  ;;  %v289_v27 = vrot.slane %v2630_v23, 6  ;;  %v301_v28 = vrot.slane %v2630_v23, 2  ;;  %v295_v33 = vrot.slane %v2630_v23, 4 }
 0x264   :  { %v288_v29 = vrot.slane %v2632_v25, 6  ;;  %v294_v30 = vrot.slane %v2632_v25, 4  ;;  %2171 = vmatprep.mubr.msk.f32.mxu1 %vm155_vm1, %v2632_v25  ;;  %v300_v32 = vrot.slane %v2632_v25, 2  ;;  %v328_v53 = vmul.f32 %v2662_v46, %v2632_v25 }
 0x266   :  { %v290_v35 = vsel %vm287_vm3, %v288_v29, %v289_v27  ;;  %v302_v36 = vsel %vm299_vm5, %v300_v32, %v301_v28  ;;  %v296_v38 = vsel %vm293_vm4, %v294_v30, %v295_v33  ;;  %v2657_v44 = vsel %vm287_vm3, %v2630_v23, %v288_v29 }
 0x267   :  { %v332_v39 = vmul.f32 %v2644_v34, %v302_v36  ;;  %v307_v40 = vsel %vm299_vm5, %v296_v38, %v300_v32  ;;  %v306_v41 = vsel %vm293_vm4, %v290_v35, %v294_v30  ;;  %v329_v52 = vmul.f32 %v2653_v43, %v2657_v44  ;;  %v137_v35 = vld [vmem:[%s3068_s1 + $0x118] sm:$0xff]  ;;  %v135_v38 = vld [vmem:[%s3068_s1 + $0x108] sm:$0xff] }
 0x268   :  { %v331_v42 = vmul.f32 %v2628_v21, %v307_v40  ;;  %v330_v45 = vmul.f32 %v2634_v26, %v306_v41  ;;  %2200 = vmatprep.subr.mxu0 %v137_v35 }
 0x269   :  { %366 = vrot.lane.b32.xlu1 %v332_v39, %s2401_s13  ;;  %2201 = vmatpush3.msra.mxu0 %v137_v35  ;;  %v134_v39 = vld [vmem:[%s3068_s1 + $0x100] sm:$0xff] }
 0x26a   :  { %364 = vrot.lane.b32.xlu0 %v331_v42, %s2401_s13 }
 0x26d   :  { %362 = vrot.lane.b32.xlu1 %v330_v45, %s2401_s13 }
 0x26e   :  { %360 = vrot.lane.b32.xlu0 %v329_v52, %s2401_s13 }
 0x271   :  { %358 = vrot.lane.b32.xlu1 %v328_v53, %s2401_s13 }
 0x272   :  { %341 = vrot.lane.b32.xlu0 %v2573_v48, %s2402_s14 }
 0x275   :  { %339 = vrot.lane.b32.xlu1 %v2568_v47, %s2402_s14 }
 0x276   :  { %337 = vrot.lane.b32.xlu0 %v2582_v49, %s2402_s14 }
 0x279   :  { %335 = vrot.lane.b32.xlu1 %v2596_v51, %s2402_s14 }
 0x27a   :  { %333 = vrot.lane.b32.xlu0 %v2587_v50, %s2402_s14 }
 0x2db   :  { %v367_v54 = vpop.permute.xlu1 %366 }
 0x2dc   :  { %2161 = vmatprep.subr.msk.mxu1 %vm155_vm1, %v367_v54  ;;  %v365_v55 = vpop.permute.xlu0 %364 }
 0x2dd   :  { %2162 = vmatpush3.xpose.msk.msra.mxu1 %vm155_vm1, %v367_v54 }
 0x2de   :  { %2163 = vmatprep.subr.msk.mxu1 %vm155_vm1, %v365_v55 }
 0x2df   :  { %v363_v56 = vpop.permute.xlu1 %362 }
 0x2e0   :  { %v361_v57 = vpop.permute.xlu0 %360 }
 0x2e1   :  { %2164 = vmatpush3.xpose.msk.msra.mxu1 %vm155_vm1, %v365_v55  ;;  %v2758_v55 = vsub.s32 2, %v2600_v3 }
 0x2e2   :  { %2165 = vmatprep.subr.msk.mxu1 %vm155_vm1, %v363_v56 }
 0x2e3   :  { %v359_v58 = vpop.permute.xlu1 %358 }
 0x2e4   :  { %v2686_v59 = vpop.permute.xlu0 %341 }
 0x2e5   :  { %v352_v60 = vmul.f32 %v2686_v59, %v302_v36  ;;  %2166 = vmatpush3.xpose.msk.msra.mxu1 %vm155_vm1, %v363_v56  ;;  %v136_v36 = vld [vmem:[%s3068_s1 + $0x110] sm:$0xff]  ;;  %v737_v56 = vrot.slane %v2608_v5, %v2758_v55 }
 0x2e6   :  { %2167 = vmatprep.subr.msk.mxu1 %vm155_vm1, %v361_v57  ;;  %2202 = vmatprep.subr.mxu0 %v136_v36 }
 0x2e7   :  { %v2691_v61 = vpop.permute.xlu1 %339  ;;  %484 = vrot.lane.b32.xlu0 %v352_v60, %s2402_s14  ;;  %2203 = vmatpush3.msra.mxu0 %v136_v36 }
 0x2e8   :  { %v351_v62 = vmul.f32 %v2691_v61, %v307_v40  ;;  %v2695_v63 = vpop.permute.xlu0 %337  ;;  %2204 = vmatprep.subr.mxu0 %v135_v38 }
 0x2e9   :  { %2168 = vmatpush3.xpose.msk.msra.mxu1 %vm155_vm1, %v361_v57  ;;  %v350_v0 = vmul.f32 %v2695_v63, %v306_v41  ;;  %2205 = vmatpush3.msra.mxu0 %v135_v38  ;;  %v772_v38 = vsub.s32 3, %v2600_v3 }
 0x2ea   :  { %482 = vrot.lane.b32.xlu1 %v351_v62, %s2402_s14  ;;  %2169 = vmatprep.subr.msk.mxu1 %vm155_vm1, %v359_v58 }
 0x2eb   :  { %v2707_v2 = vpop.permute.xlu1 %335  ;;  %2206 = vmatprep.subr.mxu0 %v134_v39 }
 0x2ec   :  { %v2705_v1 = vpop.permute.xlu0 %333  ;;  %v349_v20 = vmul.f32 %v2707_v2, %v2657_v44  ;;  %2207 = vmatpush3.msra.mxu0 %v134_v39  ;;  %v778_v39 = vsub.s32 4, %v2600_v3 }
 0x2ed   :  { %2170 = vmatpush3.xpose.msk.msra.mxu1 %vm155_vm1, %v359_v58  ;;  %v348_v18 = vmul.f32 %v2705_v1, %v2632_v25 }
 0x2ee   :  { %480 = vrot.lane.b32.xlu1 %v350_v0, %s2402_s14 }
 0x2f0   :  { %2172 = vmatmul.mubr.msk.f32.vlgmr.msra.gmra.mxu1 %vm155_vm1, %v2630_v23 }
 0x359   :  { %v485_v7 = vpop.permute.xlu0 %484 }
 0x35a   :  { %2174 = vmatprep.subr.mxu1 %v485_v7 }
 0x35b   :  { %2175 = vmatpush3.msra.mxu1 %v485_v7 }
 0x35c   :  { %v483_v8 = vpop.permute.xlu1 %482 }
 0x35d   :  { %2176 = vmatprep.subr.mxu1 %v483_v8 }
 0x35e   :  { %2177 = vmatpush3.msra.mxu1 %v483_v8 }
 0x360   :  { %v481_v9 = vpop.permute.xlu1 %480 }
 0x361   :  { %2178 = vmatprep.subr.mxu1 %v481_v9 }
 0x362   :  { %2179 = vmatpush3.msra.mxu1 %v481_v9 }
 0x3b0   :  { %v2173_v11 = vpop.f32.mrf.mxu1 }
 0x3b1   :  { %v454_v13 = vadd.f32 %v2173_v11, %v2712_v10 }
 0x3b2   :  { %v448_v14 = vpop.f32.mrf.mxu1 }
 0x3b3   :  { %v449_v15 = vadd.f32 %v448_v14, %v2717_v12  ;;  %v462_v16 = vsel %vm461_vm6, %v454_v13, -inf  ;;  %v154_v14 = vld [vmem:[%s3070_s2 + $0x50] sm:$0xff] }
 0x3b4   :  { %463 = vmax.xlane.f32.xlu0 %v462_v16  ;;  %v152_v16 = vld [vmem:[%s3070_s2 + $0x40] sm:$0xff] }
 0x3b5   :  { %v458_v17 = vsel %vm457_vm7, %v449_v15, -inf }
 0x3b6   :  { %459 = vmax.xlane.f32.xlu1 %v458_v17  ;;  %v151_v17 = vld [vmem:[%s3070_s2 + $0x38] sm:$0xff] }
 0x3c7   :  { %476 = vrot.lane.b32.xlu1 %v348_v18, %s2402_s14 }
 0x3ca   :  { %478 = vrot.lane.b32.xlu0 %v349_v20, %s2402_s14 }
 0x43d   :  { %v464_v22 = vpop.xlane.xlu0 %463 }
 0x43e   :  { %v466_v23 = vsub.f32 %v454_v13, %v464_v22 }
 0x43f   :  { %v460_v24 = vpop.xlane.xlu1 %459 }
 0x440   :  { %v465_v27 = vsub.f32 %v449_v15, %v460_v24  ;;  %v469_v28 = vmul.f32 1.442695, %v466_v23  ;;  %v153_v15 = vld [vmem:[%s3070_s2 + $0x48] sm:$0xff] }
 0x441   :  { %v479_v29 = vpop.permute.xlu0 %478 }
 0x442   :  { %v467_v30 = vmul.f32 1.442695, %v465_v27  ;;  %2180 = vmatprep.subr.mxu1 %v479_v29 }
 0x443   :  { %v477_v32 = vpop.permute.xlu1 %476  ;;  %2181 = vmatpush3.msra.mxu1 %v479_v29 }
 0x444   :  { %2351 = vpow2.f32 %v467_v30  ;;  %2182 = vmatprep.subr.mxu1 %v477_v32 }
 0x445   :  { %2353 = vpow2.f32 %v469_v28  ;;  %2183 = vmatpush3.msra.mxu1 %v477_v32 }
 0x446   :  { %2187 = vmatprep.subr.mxu1 %v2573_v48 }
 0x451   :  { %v2352_v25 = vpop.eup %2351 }
 0x452   :  { %v2354_v33 = vpop.eup %2353  ;;  %2184 = vmatprep.mubr.msk.f32.mxu1 %vm457_vm7, %v2352_v25 }
 0x453   :  { %2185 = vmatmul.mubr.msk.f32.vlgmr.msra.gmra.mxu1 %vm457_vm7, %v2354_v33 }
 0x454   :  { %2188 = vmatpush3.msra.mxu1 %v2573_v48  ;;  %2197 = vmatprep.mubr.msk.f32.mxu1 %vm457_vm7, %v2352_v25 }
 0x455   :  { %2189 = vmatprep.subr.mxu1 %v2568_v47 }
 0x456   :  { %2190 = vmatpush3.msra.mxu1 %v2568_v47 }
 0x457   :  { %2191 = vmatprep.subr.mxu1 %v2582_v49 }
 0x458   :  { %2192 = vmatpush3.msra.mxu1 %v2582_v49 }
 0x459   :  { %2193 = vmatprep.subr.mxu1 %v2596_v51 }
 0x45a   :  { %2194 = vmatpush3.msra.mxu1 %v2596_v51 }
 0x45b   :  { %2195 = vmatprep.subr.mxu1 %v2587_v50 }
 0x45c   :  { %2196 = vmatpush3.msra.mxu1 %v2587_v50 }
 0x45d   :  { %2198 = vmatmul.mubr.msk.f32.vlgmr.msra.gmra.mxu1 %vm457_vm7, %v2354_v33  ;;  %2211 = vmatprep.subr.mxu1 %v154_v14 }
 0x45e   :  { %2212 = vmatpush3.msra.mxu1 %v154_v14  ;;  %v138_v14 = vld [vmem:[%s3068_s1 + $0x120] sm:$0xff] }
 0x45f   :  { %2213 = vmatprep.subr.mxu1 %v153_v15 }
 0x460   :  { %2214 = vmatpush3.msra.mxu1 %v153_v15  ;;  %v785_v15 = vrot.slane %v2624_v19, %v2611_v6 }
 0x461   :  { %2215 = vmatprep.subr.mxu1 %v152_v16 }
 0x462   :  { %2216 = vmatpush3.msra.mxu1 %v152_v16 }
 0x463   :  { %2217 = vmatprep.subr.mxu1 %v151_v17 }
 0x464   :  { %2218 = vmatpush3.msra.mxu1 %v151_v17 }
 0x513   :  { %v2186_v40 = vpop.f32.mrf.mxu1 }
 0x515   :  { %v563_v41 = vpop.f32.mrf.mxu1 }
 0x51d   :  { %v2199_v42 = vpop.f32.mrf.mxu1 }
 0x51e   :  { %2355 = vrcp.f32 %v2199_v42 }
 0x51f   :  { %v638_v44 = vpop.f32.mrf.mxu1 }
 0x520   :  { %2357 = vrcp.f32 %v638_v44 }
 0x52b   :  { %v2356_v45 = vpop.eup %2355 }
 0x52c   :  { %v650_v54 = vmul.f32 %v2356_v45, %v2186_v40  ;;  %v779_v45 = vrot.slane %v2608_v5, %v778_v39 }
 0x52d   :  { %v2358_v52 = vpop.eup %2357 }
 0x52e   :  { %v648_v53 = vmul.f32 %v2358_v52, %v563_v41  ;;  %v773_v41 = vrot.slane %v2608_v5, %v772_v38 }
 0x530   :  { %2208 = vmatprep.mubr.msk.f32.mxu0 %vm155_vm1, %v648_v53 }
 0x531   :  { %2209 = vmatmul.mubr.msk.f32.vlgmr.msra.gmra.mxu0 %vm155_vm1, %v650_v54 }
 0x5f1   :  { %v2210_v57 = vpop.f32.mrf.mxu0 }
 0x5f2   :  { %v733_v58 = vadd.f32 %v2210_v57, %v2545_v37 }
 0x5f3   :  { %v723_v60 = vpop.f32.mrf.mxu0 }
 0x5f4   :  { %v2763_v62 = vadd.f32 %v737_v56, %v733_v58  ;;  %v732_v0 = vadd.f32 %v723_v60, %v2536_v31 }
 0x5f6   :  { %v2766_v7 = vadd.f32 %v737_v56, %v732_v0  ;;  %v743_v8 = vsel %vm159_vm2, %v2763_v62, 0.0  ;;  %v749_v13 = vmul.f32 %v2763_v62, %v2763_v62  ;;  %v145_v0 = vld [vmem:[%s3068_s1 + $0x158] sm:$0xff] }
 0x5f7   :  { %744 = vadd.xlane.f32.xlu1 %v743_v8  ;;  %2222 = vmatprep.subr.mxu0 %v145_v0  ;;  %v144_v8 = vld [vmem:[%s3068_s1 + $0x150] sm:$0xff] }
 0x5f8   :  { %v740_v9 = vsel %vm155_vm1, %v2766_v7, 0.0  ;;  %v748_v11 = vmul.f32 %v2766_v7, %v2766_v7  ;;  %v753_v31 = vsel %vm159_vm2, %v749_v13, 0.0  ;;  %2223 = vmatpush3.msra.mxu0 %v145_v0  ;;  %v140_v13 = vld [vmem:[%s3068_s1 + $0x130] sm:$0xff] }
 0x5f9   :  { %741 = vadd.xlane.f32.xlu0 %v740_v9  ;;  %2224 = vmatprep.subr.mxu0 %v144_v8  ;;  %v143_v9 = vld [vmem:[%s3068_s1 + $0x148] sm:$0xff] }
 0x5fa   :  { %v750_v37 = vsel %vm155_vm1, %v748_v11, 0.0  ;;  %2225 = vmatpush3.msra.mxu0 %v144_v8  ;;  %v142_v11 = vld [vmem:[%s3068_s1 + $0x140] sm:$0xff] }
 0x5fb   :  { %2226 = vmatprep.subr.mxu0 %v143_v9 }
 0x5fc   :  { %2227 = vmatpush3.msra.mxu0 %v143_v9 }
 0x5fd   :  { %751 = vadd.xlane.f32.xlu0 %v750_v37  ;;  %2228 = vmatprep.subr.mxu0 %v142_v11  ;;  %v141_v37 = vld [vmem:[%s3068_s1 + $0x138] sm:$0xff] }
 0x5fe   :  { %2229 = vmatpush3.msra.mxu0 %v142_v11 }
 0x5ff   :  { %2230 = vmatprep.subr.mxu0 %v141_v37 }
 0x600   :  { %2231 = vmatpush3.msra.mxu0 %v141_v37 }
 0x601   :  { %754 = vadd.xlane.f32.xlu0 %v753_v31  ;;  %2232 = vmatprep.subr.mxu0 %v140_v13  ;;  %v139_v31 = vld [vmem:[%s3068_s1 + $0x128] sm:$0xff] }
 0x602   :  { %2233 = vmatpush3.msra.mxu0 %v140_v13 }
 0x603   :  { %2234 = vmatprep.subr.mxu0 %v139_v31 }
 0x604   :  { %2235 = vmatpush3.msra.mxu0 %v139_v31 }
 0x605   :  { %2236 = vmatprep.subr.mxu0 %v138_v14 }
 0x606   :  { %2237 = vmatpush3.msra.mxu0 %v138_v14 }
 0x680   :  { %v745_v22 = vpop.xlane.xlu1 %744 }
 0x681   :  { %v747_v24 = vmul.f32 0.03125, %v745_v22 }
 0x682   :  { %v742_v18 = vpop.xlane.xlu0 %741 }
 0x683   :  { %v746_v20 = vmul.f32 0.03125, %v742_v18  ;;  %v759_v32 = vmul.f32 %v747_v24, %v747_v24  ;;  %v763_v52 = vsub.f32 %v2763_v62, %v747_v24 }
 0x685   :  { %v758_v27 = vmul.f32 %v746_v20, %v746_v20  ;;  %v762_v40 = vsub.f32 %v2766_v7, %v746_v20 }
 0x686   :  { %v752_v23 = vpop.xlane.xlu0 %751 }
 0x687   :  { %v756_v28 = vmul.f32 0.03125, %v752_v23 }
 0x689   :  { %v760_v29 = vsub.f32 %v756_v28, %v758_v27 }
 0x68a   :  { %v755_v30 = vpop.xlane.xlu0 %754 }
 0x68b   :  { %v764_v25 = vadd.f32 1e-12, %v760_v29  ;;  %v757_v33 = vmul.f32 0.03125, %v755_v30 }
 0x68d   :  { %2359 = vrsqrt.f32 %v764_v25  ;;  %v761_v35 = vsub.f32 %v757_v33, %v759_v32 }
 0x68f   :  { %v765_v36 = vadd.f32 1e-12, %v761_v35 }
 0x691   :  { %2361 = vrsqrt.f32 %v765_v36 }
 0x69a   :  { %v2360_v42 = vpop.eup %2359 }
 0x69b   :  { %v768_v44 = vmul.f32 %v2360_v42, %v762_v40 }
 0x69d   :  { %v774_v53 = vmul.f32 %v773_v41, %v768_v44 }
 0x69e   :  { %v2362_v54 = vpop.eup %2361 }
 0x69f   :  { %v769_v56 = vmul.f32 %v2362_v54, %v763_v52  ;;  %v780_v57 = vadd.f32 %v779_v45, %v774_v53 }
 0x6a1   :  { %v775_v58 = vmul.f32 %v773_v41, %v769_v56  ;;  %2219 = vmatprep.mubr.msk.f32.mxu1 %vm155_vm1, %v780_v57 }
 0x6a3   :  { %v781_v60 = vadd.f32 %v779_v45, %v775_v58 }
 0x6a5   :  { %2220 = vmatmul.mubr.msk.f32.vlgmr.msra.gmra.mxu1 %vm155_vm1, %v781_v60 }
 0x765   :  { %v2221_v16 = vpop.f32.mrf.mxu1 }
 0x766   :  { %v864_v17 = vadd.f32 %v2221_v16, %v785_v15 }
 0x767   :  { %v858_v18 = vpop.f32.mrf.mxu1 }
 0x768   :  { %v870_v20 = vmul.f32 0.70710677, %v864_v17  ;;  %v859_v22 = vadd.f32 %v858_v18, %v785_v15 }
 0x76a   :  { %v872_v23 = vand.u32 2147483647, %v870_v20  ;;  %v869_v24 = vmul.f32 0.70710677, %v859_v22  ;;  %vm912_vm8 = vcmp.ge.f32.partialorder %v870_v20, 0.0 }
 0x76c   :  { %v874_v27 = vmul.f32 0.3275911, %v872_v23  ;;  %v871_v28 = vand.u32 2147483647, %v869_v24  ;;  %v900_v25 = vsub.f32 0.0, %v872_v23  ;;  %vm911_vm9 = vcmp.ge.f32.partialorder %v869_v24, 0.0 }
 0x76e   :  { %v876_v29 = vadd.f32 1.0, %v874_v27  ;;  %v873_v30 = vmul.f32 0.3275911, %v871_v28  ;;  %v899_v33 = vsub.f32 0.0, %v871_v28  ;;  %v902_v35 = vmul.f32 %v900_v25, %v872_v23 }
 0x770   :  { %2363 = vrcp.f32 %v876_v29  ;;  %v875_v32 = vadd.f32 1.0, %v873_v30  ;;  %v901_v40 = vmul.f32 %v899_v33, %v871_v28  ;;  %v905_v41 = vmul.f32 1.442695, %v902_v35 }
 0x772   :  { %2365 = vrcp.f32 %v875_v32  ;;  %v903_v52 = vmul.f32 1.442695, %v901_v40  ;;  %v867_v40 = vmul.f32 0.5, %v859_v22 }
 0x773   :  { %2367 = vpow2.f32 %v905_v41  ;;  %v868_v41 = vmul.f32 0.5, %v864_v17 }
 0x774   :  { %2369 = vpow2.f32 %v903_v52 }
 0x77d   :  { %v2364_v36 = vpop.eup %2363 }
 0x77e   :  { %v882_v19 = vmul.f32 1.0614054, %v2364_v36 }
 0x77f   :  { %v2366_v42 = vpop.eup %2365 }
 0x780   :  { %v2016_v44 = vadd.f32 -1.4531521, %v882_v19  ;;  %v881_v45 = vmul.f32 1.0614054, %v2366_v42  ;;  %v2368_v14 = vpop.eup %2367 }
 0x781   :  { %v2370_v23 = vpop.eup %2369 }
 0x782   :  { %v886_v53 = vmul.f32 %v2364_v36, %v2016_v44  ;;  %v2015_v54 = vadd.f32 -1.4531521, %v881_v45 }
 0x784   :  { %v888_v56 = vadd.f32 1.4214138, %v886_v53  ;;  %v885_v57 = vmul.f32 %v2366_v42, %v2015_v54 }
 0x786   :  { %v890_v58 = vmul.f32 %v2364_v36, %v888_v56  ;;  %v887_v60 = vadd.f32 1.4214138, %v885_v57 }
 0x788   :  { %v2018_v0 = vadd.f32 -0.28449672, %v890_v58  ;;  %v889_v8 = vmul.f32 %v2366_v42, %v887_v60  ;;  %v1026_v58 = vld [vmem:[%s3070_s2 + $0x70] sm:$0xff]  ;;  %v1025_v60 = vld [vmem:[%s3070_s2 + $0x68] sm:$0xff] }
 0x789   :  { %2241 = vmatprep.subr.mxu1 %v1026_v58 }
 0x78a   :  { %v894_v9 = vmul.f32 %v2364_v36, %v2018_v0  ;;  %v2017_v11 = vadd.f32 -0.28449672, %v889_v8  ;;  %2242 = vmatpush3.msra.mxu1 %v1026_v58  ;;  %v1024_v0 = vld [vmem:[%s3070_s2 + $0x60] sm:$0xff]  ;;  %v1023_v8 = vld [vmem:[%s3070_s2 + $0x58] sm:$0xff] }
 0x78b   :  { %2243 = vmatprep.subr.mxu1 %v1025_v60 }
 0x78c   :  { %v896_v37 = vadd.f32 0.2548296, %v894_v9  ;;  %v893_v13 = vmul.f32 %v2366_v42, %v2017_v11  ;;  %2244 = vmatpush3.msra.mxu1 %v1025_v60 }
 0x78d   :  { %2245 = vmatprep.subr.mxu1 %v1024_v0 }
 0x78e   :  { %v898_v31 = vmul.f32 %v2364_v36, %v896_v37  ;;  %v895_v15 = vadd.f32 0.2548296, %v893_v13  ;;  %2246 = vmatpush3.msra.mxu1 %v1024_v0 }
 0x78f   :  { %2247 = vmatprep.subr.mxu1 %v1023_v8 }
 0x790   :  { %v908_v16 = vmul.f32 %v2368_v14, %v898_v31  ;;  %v897_v18 = vmul.f32 %v2366_v42, %v895_v15  ;;  %v1006_v42 = vsub.s32 5, %v2600_v3  ;;  %2248 = vmatpush3.msra.mxu1 %v1023_v8 }
 0x792   :  { %v910_v27 = vsub.f32 1.0, %v908_v16  ;;  %v907_v28 = vmul.f32 %v2370_v23, %v897_v18  ;;  %v1007_v20 = vrot.slane %v2608_v5, %v1006_v42 }
 0x794   :  { %v914_v29 = vsub.f32 0.0, %v910_v27  ;;  %v909_v30 = vsub.f32 1.0, %v907_v28 }
 0x796   :  { %v916_v32 = vsel %vm912_vm8, %v910_v27, %v914_v29  ;;  %v913_v25 = vsub.f32 0.0, %v909_v30 }
 0x797   :  { %v918_v33 = vadd.f32 1.0, %v916_v32  ;;  %v2865_v32 = vld [vmem:[%s3068_s1 + $0x160] sm:$0x3f] }
 0x798   :  { %v915_v35 = vsel %vm911_vm9, %v909_v30, %v913_v25 }
 0x799   :  { %v917_v19 = vadd.f32 1.0, %v915_v35  ;;  %v920_v36 = vmul.f32 %v918_v33, %v868_v41  ;;  %v1065_v35 = vrot.slane %v2865_v32, %v2603_v4 }
 0x79b   :  { %v919_v44 = vmul.f32 %v917_v19, %v867_v40 }
 0x79d   :  { %2238 = vmatprep.mubr.msk.f32.mxu0 %vm51_vm0, %v919_v44 }
 0x79e   :  { %2239 = vmatmul.mubr.msk.f32.vlgmr.msra.gmra.mxu0 %vm51_vm0, %v920_v36 }
 0x85e   :  { %v2240_v45 = vpop.f32.mrf.mxu0 }
 0x85f   :  { %v1003_v24 = vadd.f32 %v2240_v45, %v2763_v62 }
 0x860   :  { %v993_v52 = vpop.f32.mrf.mxu0 }
 0x861   :  { %v2835_v53 = vadd.f32 %v1007_v20, %v1003_v24  ;;  %v1002_v17 = vadd.f32 %v993_v52, %v2766_v7 }
 0x863   :  { %v2838_v22 = vadd.f32 %v1007_v20, %v1002_v17  ;;  %v1035_v54 = vsel %vm159_vm2, %v2835_v53, 0.0  ;;  %v1041_v56 = vmul.f32 %v2835_v53, %v2835_v53  ;;  %v1071_v20 = vrot.slane %v2865_v32, %v2611_v6  ;;  %v2878_v17 = vld [vmem:[%s3070_s2 + $0x78] sm:$0x3] }
 0x864   :  { %1036 = vadd.xlane.f32.xlu1 %v1035_v54  ;;  %v1077_v54 = vrot.slane %v2878_v17, %v2603_v4 }
 0x865   :  { %v1032_v5 = vsel %vm155_vm1, %v2838_v22, 0.0  ;;  %v1040_v62 = vmul.f32 %v2838_v22, %v2838_v22  ;;  %v1045_v57 = vsel %vm159_vm2, %v1041_v56, 0.0 }
 0x866   :  { %1033 = vadd.xlane.f32.xlu0 %v1032_v5 }
 0x867   :  { %v1042_v7 = vsel %vm155_vm1, %v1040_v62, 0.0 }
 0x868   :  { %1046 = vadd.xlane.f32.xlu1 %v1045_v57 }
 0x86a   :  { %1043 = vadd.xlane.f32.xlu0 %v1042_v7 }
 0x8ed   :  { %v1037_v9 = vpop.xlane.xlu1 %1036 }
 0x8ee   :  { %v1039_v11 = vmul.f32 0.03125, %v1037_v9 }
 0x8ef   :  { %v1034_v37 = vpop.xlane.xlu0 %1033 }
 0x8f0   :  { %v1038_v13 = vmul.f32 0.03125, %v1034_v37  ;;  %v1051_v14 = vmul.f32 %v1039_v11, %v1039_v11  ;;  %v1055_v25 = vsub.f32 %v2835_v53, %v1039_v11 }
 0x8f1   :  { %v1047_v31 = vpop.xlane.xlu1 %1046 }
 0x8f2   :  { %v1049_v15 = vmul.f32 0.03125, %v1047_v31  ;;  %v1050_v18 = vmul.f32 %v1038_v13, %v1038_v13  ;;  %v1054_v40 = vsub.f32 %v2838_v22, %v1038_v13 }
 0x8f3   :  { %v1044_v16 = vpop.xlane.xlu0 %1043 }
 0x8f4   :  { %v1053_v23 = vsub.f32 %v1049_v15, %v1051_v14  ;;  %v1048_v27 = vmul.f32 0.03125, %v1044_v16 }
 0x8f6   :  { %v1057_v28 = vadd.f32 1e-12, %v1053_v23  ;;  %v1052_v29 = vsub.f32 %v1048_v27, %v1050_v18 }
 0x8f8   :  { %2371 = vrsqrt.f32 %v1057_v28  ;;  %v1056_v30 = vadd.f32 1e-12, %v1052_v29 }
 0x8fa   :  { %2373 = vrsqrt.f32 %v1056_v30 }
 0x905   :  { %v2372_v33 = vpop.eup %2371 }
 0x906   :  { %v1061_v19 = vmul.f32 %v2372_v33, %v1055_v25 }
 0x907   :  { %v2374_v41 = vpop.eup %2373 }
 0x908   :  { %v1060_v44 = vmul.f32 %v2374_v41, %v1054_v40  ;;  %v1067_v36 = vmul.f32 %v1065_v35, %v1061_v19 }
 0x90a   :  { %v1066_v45 = vmul.f32 %v1065_v35, %v1060_v44  ;;  %v1073_v52 = vadd.f32 %v1071_v20, %v1067_v36 }
 0x90c   :  { %v1072_v24 = vadd.f32 %v1071_v20, %v1066_v45 }
 0x90e   :  { %2249 = vmatprep.mubr.msk.f32.mxu1 %vm155_vm1, %v1072_v24 }
 0x90f   :  { %2250 = vmatmul.mubr.msk.f32.vlgmr.msra.gmra.mxu1 %vm155_vm1, %v1073_v52 }
 0x9cf   :  { %v2251_v56 = vpop.f32.mrf.mxu1 }
 0x9d0   :  { %v1156_v5 = vadd.f32 %v2251_v56, %v1077_v54 }
 0x9d1   :  { %v1150_v62 = vpop.f32.mrf.mxu1 }
 0x9d2   :  { %v2882_v57 = vadd.f32 %v1150_v62, %v1077_v54  ;;  %v1172_v7 = vrot.slane %v1156_v5, 2  ;;  %v1167_v58 = vrot.slane %v1156_v5, 4  ;;  %v1162_v9 = vrot.slane %v1156_v5, 6 }
 0x9d4   :  { %2262 = vmatprep.mubr.msk.f32.mxu1 %vm155_vm1, %v2882_v57  ;;  %v1171_v60 = vrot.slane %v2882_v57, 2  ;;  %v1166_v0 = vrot.slane %v2882_v57, 4  ;;  %v1161_v8 = vrot.slane %v2882_v57, 6  ;;  %v1179_v18 = vmul.f32 %v2882_v57, %v2662_v46 }
 0x9d5   :  { %v1184_v36 = vmul.f32 %v2882_v57, %v2705_v1 }
 0x9d6   :  { %v1173_v11 = vsel %vm299_vm5, %v1171_v60, %v1172_v7  ;;  %v1168_v37 = vsel %vm293_vm4, %v1166_v0, %v1167_v58  ;;  %v1163_v13 = vsel %vm287_vm3, %v1161_v8, %v1162_v9  ;;  %v1176_v27 = vsel %vm287_vm3, %v1156_v5, %v1161_v8 }
 0x9d7   :  { %v1183_v31 = vmul.f32 %v1173_v11, %v2644_v34  ;;  %v1178_v14 = vsel %vm299_vm5, %v1168_v37, %v1171_v60  ;;  %v1177_v16 = vsel %vm293_vm4, %v1163_v13, %v1166_v0  ;;  %v1188_v34 = vmul.f32 %v1173_v11, %v2686_v59 }
 0x9d8   :  { %v1182_v15 = vmul.f32 %v1178_v14, %v2628_v21  ;;  %v1181_v23 = vmul.f32 %v1177_v16, %v2634_v26  ;;  %v1180_v21 = vmul.f32 %v1176_v27, %v2653_v43  ;;  %v1187_v28 = vmul.f32 %v1178_v14, %v2691_v61 }
 0x9d9   :  { %1202 = vrot.lane.b32.xlu0 %v1183_v31, %s2401_s13  ;;  %v1186_v26 = vmul.f32 %v1177_v16, %v2695_v63  ;;  %v1185_v20 = vmul.f32 %v1176_v27, %v2707_v2  ;;  %v1571_v9 = vrot.slane %v2865_v32, %v2758_v55 }
 0x9da   :  { %1200 = vrot.lane.b32.xlu1 %v1182_v15, %s2401_s13 }
 0x9dd   :  { %1194 = vrot.lane.b32.xlu0 %v1179_v18, %s2401_s13 }
 0x9de   :  { %1198 = vrot.lane.b32.xlu1 %v1181_v23, %s2401_s13 }
 0x9e1   :  { %1318 = vrot.lane.b32.xlu0 %v1188_v34, %s2402_s14  ;;  %v1031_v34 = vld [vmem:[%s3070_s2 + $0x98] sm:$0xff] }
 0x9e2   :  { %1196 = vrot.lane.b32.xlu1 %v1180_v21, %s2401_s13  ;;  %v1030_v21 = vld [vmem:[%s3070_s2 + $0x90] sm:$0xff] }
 0x9e6   :  { %1316 = vrot.lane.b32.xlu1 %v1187_v28, %s2402_s14  ;;  %v1029_v28 = vld [vmem:[%s3070_s2 + $0x88] sm:$0xff] }
 0x9ea   :  { %1314 = vrot.lane.b32.xlu1 %v1186_v26, %s2402_s14  ;;  %v1028_v26 = vld [vmem:[%s3070_s2 + $0x80] sm:$0xff] }
 0xa4b   :  { %v1203_v46 = vpop.permute.xlu0 %1202 }
 0xa4c   :  { %2252 = vmatprep.subr.msk.mxu1 %vm155_vm1, %v1203_v46  ;;  %v1201_v29 = vpop.permute.xlu1 %1200 }
 0xa4d   :  { %2253 = vmatpush3.xpose.msk.msra.mxu1 %vm155_vm1, %v1203_v46 }
 0xa4e   :  { %2254 = vmatprep.subr.msk.mxu1 %vm155_vm1, %v1201_v29 }
 0xa4f   :  { %v1195_v43 = vpop.permute.xlu0 %1194 }
 0xa50   :  { %v1199_v59 = vpop.permute.xlu1 %1198 }
 0xa51   :  { %2255 = vmatpush3.xpose.msk.msra.mxu1 %vm155_vm1, %v1201_v29 }
 0xa52   :  { %2256 = vmatprep.subr.msk.mxu1 %vm155_vm1, %v1199_v59 }
 0xa53   :  { %v1319_v61 = vpop.permute.xlu0 %1318 }
 0xa54   :  { %2265 = vmatprep.subr.mxu0 %v1319_v61  ;;  %v1197_v30 = vpop.permute.xlu1 %1196 }
 0xa55   :  { %2257 = vmatpush3.xpose.msk.msra.mxu1 %vm155_vm1, %v1199_v59  ;;  %2266 = vmatpush3.msra.mxu0 %v1319_v61 }
 0xa56   :  { %2258 = vmatprep.subr.msk.mxu1 %vm155_vm1, %v1197_v30 }
 0xa58   :  { %v1317_v63 = vpop.permute.xlu1 %1316 }
 0xa59   :  { %2259 = vmatpush3.xpose.msk.msra.mxu1 %vm155_vm1, %v1197_v30  ;;  %2267 = vmatprep.subr.mxu0 %v1317_v63 }
 0xa5a   :  { %2260 = vmatprep.subr.msk.mxu1 %vm155_vm1, %v1195_v43  ;;  %2268 = vmatpush3.msra.mxu0 %v1317_v63 }
 0xa5c   :  { %v1315_v25 = vpop.permute.xlu1 %1314 }
 0xa5d   :  { %2261 = vmatpush3.xpose.msk.msra.mxu1 %vm155_vm1, %v1195_v43  ;;  %2269 = vmatprep.subr.mxu0 %v1315_v25 }
 0xa5e   :  { %2270 = vmatpush3.msra.mxu0 %v1315_v25 }
 0xa60   :  { %2263 = vmatmul.mubr.msk.f32.vlgmr.msra.gmra.mxu1 %vm155_vm1, %v1156_v5 }
 0xb20   :  { %v2264_v33 = vpop.f32.mrf.mxu1 }
 0xb21   :  { %v1290_v35 = vadd.f32 %v2264_v33, %v2712_v10 }
 0xb22   :  { %v1284_v40 = vpop.f32.mrf.mxu1 }
 0xb23   :  { %v1285_v19 = vadd.f32 %v1284_v40, %v2717_v12  ;;  %v1296_v41 = vsel %vm461_vm6, %v1290_v35, -inf }
 0xb24   :  { %1297 = vmax.xlane.f32.xlu0 %v1296_v41 }
 0xb25   :  { %v1293_v44 = vsel %vm457_vm7, %v1285_v19, -inf }
 0xb26   :  { %1294 = vmax.xlane.f32.xlu1 %v1293_v44 }
 0xb37   :  { %1310 = vrot.lane.b32.xlu1 %v1184_v36, %s2402_s14 }
 0xb3a   :  { %1312 = vrot.lane.b32.xlu0 %v1185_v20, %s2402_s14  ;;  %v1607_v20 = vrot.slane %v2865_v32, %v772_v38  ;;  %v1022_v38 = vld [vmem:[%s3068_s1 + $0x1c0] sm:$0xff] }
 0xbad   :  { %v1298_v45 = vpop.xlane.xlu0 %1297 }
 0xbae   :  { %v1300_v10 = vsub.f32 %v1290_v35, %v1298_v45 }
 0xbaf   :  { %v1295_v24 = vpop.xlane.xlu1 %1294 }
 0xbb0   :  { %v1299_v52 = vsub.f32 %v1285_v19, %v1295_v24  ;;  %v1303_v12 = vmul.f32 1.442695, %v1300_v10  ;;  %v1613_v24 = vrot.slane %v2865_v32, %v778_v39  ;;  %v1021_v39 = vld [vmem:[%s3068_s1 + $0x1b8] sm:$0xff] }
 0xbb1   :  { %v1313_v54 = vpop.permute.xlu0 %1312 }
 0xbb2   :  { %v1301_v56 = vmul.f32 1.442695, %v1299_v52  ;;  %2271 = vmatprep.subr.mxu0 %v1313_v54 }
 0xbb3   :  { %2272 = vmatpush3.msra.mxu0 %v1313_v54  ;;  %v1311_v5 = vpop.permute.xlu1 %1310 }
 0xbb4   :  { %2375 = vpow2.f32 %v1301_v56  ;;  %2273 = vmatprep.subr.mxu0 %v1311_v5 }
 0xbb5   :  { %2377 = vpow2.f32 %v1303_v12  ;;  %2274 = vmatpush3.msra.mxu0 %v1311_v5 }
 0xbb6   :  { %2278 = vmatprep.subr.mxu0 %v2573_v48 }
 0xbc1   :  { %v2376_v1 = vpop.eup %2375 }
 0xbc2   :  { %v2378_v2 = vpop.eup %2377  ;;  %2275 = vmatprep.mubr.msk.f32.mxu0 %vm457_vm7, %v2376_v1 }
 0xbc3   :  { %2276 = vmatmul.mubr.msk.f32.vlgmr.msra.gmra.mxu0 %vm457_vm7, %v2378_v2 }
 0xbc4   :  { %2279 = vmatpush3.msra.mxu0 %v2573_v48  ;;  %2288 = vmatprep.mubr.msk.f32.mxu0 %vm457_vm7, %v2376_v1  ;;  %v1014_v48 = vld [vmem:[%s3068_s1 + $0x180] sm:$0xff] }
 0xbc5   :  { %2280 = vmatprep.subr.mxu0 %v2568_v47  ;;  %2291 = vmatprep.subr.mxu1 %v1014_v48 }
 0xbc6   :  { %2281 = vmatpush3.msra.mxu0 %v2568_v47  ;;  %v1013_v47 = vld [vmem:[%s3068_s1 + $0x178] sm:$0xff]  ;;  %2292 = vmatpush3.msra.mxu1 %v1014_v48  ;;  %v1020_v48 = vld [vmem:[%s3068_s1 + $0x1b0] sm:$0xff] }
 0xbc7   :  { %2282 = vmatprep.subr.mxu0 %v2582_v49  ;;  %2293 = vmatprep.subr.mxu1 %v1013_v47 }
 0xbc8   :  { %2283 = vmatpush3.msra.mxu0 %v2582_v49  ;;  %v1012_v49 = vld [vmem:[%s3068_s1 + $0x170] sm:$0xff]  ;;  %2294 = vmatpush3.msra.mxu1 %v1013_v47  ;;  %v1019_v47 = vld [vmem:[%s3068_s1 + $0x1a8] sm:$0xff] }
 0xbc9   :  { %2284 = vmatprep.subr.mxu0 %v2596_v51  ;;  %2295 = vmatprep.subr.mxu1 %v1012_v49 }
 0xbca   :  { %2285 = vmatpush3.msra.mxu0 %v2596_v51  ;;  %2296 = vmatpush3.msra.mxu1 %v1012_v49  ;;  %v1018_v49 = vld [vmem:[%s3068_s1 + $0x1a0] sm:$0xff] }
 0xbcb   :  { %2286 = vmatprep.subr.mxu0 %v2587_v50 }
 0xbcc   :  { %2287 = vmatpush3.msra.mxu0 %v2587_v50  ;;  %v1011_v50 = vld [vmem:[%s3068_s1 + $0x168] sm:$0xff] }
 0xbcd   :  { %2289 = vmatmul.mubr.msk.f32.vlgmr.msra.gmra.mxu0 %vm457_vm7, %v2378_v2  ;;  %2297 = vmatprep.subr.mxu1 %v1011_v50 }
 0xbce   :  { %2298 = vmatpush3.msra.mxu1 %v1011_v50  ;;  %2302 = vmatprep.subr.mxu0 %v1031_v34  ;;  %v1017_v50 = vld [vmem:[%s3068_s1 + $0x198] sm:$0xff] }
 0xbcf   :  { %2303 = vmatpush3.msra.mxu0 %v1031_v34  ;;  %2313 = vmatprep.subr.mxu1 %v1022_v38 }
 0xbd0   :  { %2304 = vmatprep.subr.mxu0 %v1030_v21 }
 0xbd1   :  { %2305 = vmatpush3.msra.mxu0 %v1030_v21 }
 0xbd2   :  { %2306 = vmatprep.subr.mxu0 %v1029_v28 }
 0xbd3   :  { %2307 = vmatpush3.msra.mxu0 %v1029_v28 }
 0xbd4   :  { %2308 = vmatprep.subr.mxu0 %v1028_v26 }
 0xbd5   :  { %2309 = vmatpush3.msra.mxu0 %v1028_v26 }
 0xc83   :  { %v2277_v51 = vpop.f32.mrf.mxu0 }
 0xc85   :  { %v1397_v62 = vpop.f32.mrf.mxu0 }
 0xc8d   :  { %v2290_v57 = vpop.f32.mrf.mxu0 }
 0xc8e   :  { %2379 = vrcp.f32 %v2290_v57  ;;  %v1619_v57 = vrot.slane %v2878_v17, %v2611_v6 }
 0xc8f   :  { %v1472_v7 = vpop.f32.mrf.mxu0 }
 0xc90   :  { %2381 = vrcp.f32 %v1472_v7 }
 0xc9b   :  { %v2380_v58 = vpop.eup %2379 }
 0xc9c   :  { %v1484_v8 = vmul.f32 %v2380_v58, %v2277_v51  ;;  %v1016_v51 = vld [vmem:[%s3068_s1 + $0x190] sm:$0xff] }
 0xc9d   :  { %v2382_v60 = vpop.eup %2381 }
 0xc9e   :  { %v1482_v0 = vmul.f32 %v2382_v60, %v1397_v62  ;;  %v1015_v62 = vld [vmem:[%s3068_s1 + $0x188] sm:$0xff] }
 0xca0   :  { %2299 = vmatprep.mubr.msk.f32.mxu1 %vm155_vm1, %v1482_v0 }
 0xca1   :  { %2300 = vmatmul.mubr.msk.f32.vlgmr.msra.gmra.mxu1 %vm155_vm1, %v1484_v8 }
 0xca2   :  { %2314 = vmatpush3.msra.mxu1 %v1022_v38 }
 0xca3   :  { %2315 = vmatprep.subr.mxu1 %v1021_v39 }
 0xca4   :  { %2316 = vmatpush3.msra.mxu1 %v1021_v39 }
 0xca5   :  { %2317 = vmatprep.subr.mxu1 %v1020_v48 }
 0xca6   :  { %2318 = vmatpush3.msra.mxu1 %v1020_v48 }
 0xca7   :  { %2319 = vmatprep.subr.mxu1 %v1019_v47 }
 0xca8   :  { %2320 = vmatpush3.msra.mxu1 %v1019_v47 }
 0xca9   :  { %2321 = vmatprep.subr.mxu1 %v1018_v49 }
 0xcaa   :  { %2322 = vmatpush3.msra.mxu1 %v1018_v49 }
 0xcab   :  { %2323 = vmatprep.subr.mxu1 %v1017_v50 }
 0xcac   :  { %2324 = vmatpush3.msra.mxu1 %v1017_v50 }
 0xcad   :  { %2325 = vmatprep.subr.mxu1 %v1016_v51 }
 0xcae   :  { %2326 = vmatpush3.msra.mxu1 %v1016_v51 }
 0xcaf   :  { %2327 = vmatprep.subr.mxu1 %v1015_v62 }
 0xcb0   :  { %2328 = vmatpush3.msra.mxu1 %v1015_v62  ;;  %v1841_v62 = vrot.slane %v2865_v32, %v1006_v42  ;;  %v1890_v32 = vld [vmem:[%s3068_s1 + $0x1e8] sm:$0xff] }
 0xcb1   :  { %2332 = vmatprep.subr.mxu0 %v1890_v32 }
 0xd61   :  { %v2301_v11 = vpop.f32.mrf.mxu1 }
 0xd62   :  { %v1567_v37 = vadd.f32 %v2301_v11, %v2835_v53 }
 0xd63   :  { %v1557_v13 = vpop.f32.mrf.mxu1 }
 0xd64   :  { %v2963_v31 = vadd.f32 %v1571_v9, %v1567_v37  ;;  %v1566_v14 = vadd.f32 %v1557_v13, %v2838_v22 }
 0xd66   :  { %v2966_v15 = vadd.f32 %v1571_v9, %v1566_v14  ;;  %v1577_v16 = vsel %vm159_vm2, %v2963_v31, 0.0  ;;  %v1583_v27 = vmul.f32 %v2963_v31, %v2963_v31 }
 0xd67   :  { %1578 = vadd.xlane.f32.xlu1 %v1577_v16 }
 0xd68   :  { %v1574_v18 = vsel %vm155_vm1, %v2966_v15, 0.0  ;;  %v1582_v23 = vmul.f32 %v2966_v15, %v2966_v15  ;;  %v1587_v22 = vsel %vm159_vm2, %v1583_v27, 0.0 }
 0xd69   :  { %1575 = vadd.xlane.f32.xlu0 %v1574_v18 }
 0xd6a   :  { %v1584_v53 = vsel %vm155_vm1, %v1582_v23, 0.0 }
 0xd6d   :  { %1585 = vadd.xlane.f32.xlu0 %v1584_v53 }
 0xd71   :  { %1588 = vadd.xlane.f32.xlu0 %v1587_v22 }
 0xdf0   :  { %v1579_v43 = vpop.xlane.xlu1 %1578 }
 0xdf1   :  { %v1581_v61 = vmul.f32 0.03125, %v1579_v43 }
 0xdf2   :  { %v1576_v46 = vpop.xlane.xlu0 %1575 }
 0xdf3   :  { %v1580_v29 = vmul.f32 0.03125, %v1576_v46  ;;  %v1593_v35 = vmul.f32 %v1581_v61, %v1581_v61  ;;  %v1597_v52 = vsub.f32 %v2963_v31, %v1581_v61 }
 0xdf5   :  { %v1592_v30 = vmul.f32 %v1580_v29, %v1580_v29  ;;  %v1596_v36 = vsub.f32 %v2966_v15, %v1580_v29 }
 0xdf6   :  { %v1586_v59 = vpop.xlane.xlu0 %1585 }
 0xdf7   :  { %v1590_v63 = vmul.f32 0.03125, %v1586_v59 }
 0xdf9   :  { %v1594_v25 = vsub.f32 %v1590_v63, %v1592_v30 }
 0xdfa   :  { %v1589_v33 = vpop.xlane.xlu0 %1588 }
 0xdfb   :  { %v1598_v40 = vadd.f32 1e-12, %v1594_v25  ;;  %v1591_v19 = vmul.f32 0.03125, %v1589_v33 }
 0xdfd   :  { %2383 = vrsqrt.f32 %v1598_v40  ;;  %v1595_v41 = vsub.f32 %v1591_v19, %v1593_v35 }
 0xdff   :  { %v1599_v44 = vadd.f32 1e-12, %v1595_v41 }
 0xe01   :  { %2385 = vrsqrt.f32 %v1599_v44 }
 0xe0a   :  { %v2384_v45 = vpop.eup %2383 }
 0xe0b   :  { %v1602_v10 = vmul.f32 %v2384_v45, %v1596_v36 }
 0xe0d   :  { %v1608_v12 = vmul.f32 %v1607_v20, %v1602_v10 }
 0xe0e   :  { %v2386_v54 = vpop.eup %2385 }
 0xe0f   :  { %v1603_v56 = vmul.f32 %v2386_v54, %v1597_v52  ;;  %v1614_v5 = vadd.f32 %v1613_v24, %v1608_v12 }
 0xe11   :  { %v1609_v1 = vmul.f32 %v1607_v20, %v1603_v56  ;;  %2310 = vmatprep.mubr.msk.f32.mxu0 %vm155_vm1, %v1614_v5 }
 0xe13   :  { %v1615_v2 = vadd.f32 %v1613_v24, %v1609_v1 }
 0xe15   :  { %2311 = vmatmul.mubr.msk.f32.vlgmr.msra.gmra.mxu0 %vm155_vm1, %v1615_v2 }
 0xe16   :  { %2333 = vmatpush3.msra.mxu0 %v1890_v32 }
 0xed5   :  { %v2312_v7 = vpop.f32.mrf.mxu0 }
 0xed6   :  { %v1698_v58 = vadd.f32 %v2312_v7, %v1619_v57 }
 0xed7   :  { %v1692_v60 = vpop.f32.mrf.mxu0 }
 0xed8   :  { %v1704_v0 = vmul.f32 0.70710677, %v1698_v58  ;;  %v1693_v8 = vadd.f32 %v1692_v60, %v1619_v57  ;;  %v1702_v49 = vmul.f32 0.5, %v1698_v58 }
 0xeda   :  { %v1706_v9 = vand.u32 2147483647, %v1704_v0  ;;  %v1703_v11 = vmul.f32 0.70710677, %v1693_v8  ;;  %vm1746_vm10 = vcmp.ge.f32.partialorder %v1704_v0, 0.0  ;;  %v1701_v48 = vmul.f32 0.5, %v1693_v8 }
 0xedc   :  { %v1708_v37 = vmul.f32 0.3275911, %v1706_v9  ;;  %v1705_v13 = vand.u32 2147483647, %v1703_v11  ;;  %v1734_v23 = vsub.f32 0.0, %v1706_v9  ;;  %vm1745_vm11 = vcmp.ge.f32.partialorder %v1703_v11, 0.0 }
 0xede   :  { %v1710_v14 = vadd.f32 1.0, %v1708_v37  ;;  %v1707_v16 = vmul.f32 0.3275911, %v1705_v13  ;;  %v1733_v53 = vsub.f32 0.0, %v1705_v13  ;;  %v1736_v27 = vmul.f32 %v1734_v23, %v1706_v9 }
 0xee0   :  { %2387 = vrcp.f32 %v1710_v14  ;;  %v1709_v18 = vadd.f32 1.0, %v1707_v16  ;;  %v1735_v34 = vmul.f32 %v1733_v53, %v1705_v13  ;;  %v1739_v21 = vmul.f32 1.442695, %v1736_v27  ;;  %v1887_v14 = vld [vmem:[%s3068_s1 + $0x1d0] sm:$0xff] }
 0xee2   :  { %2389 = vrcp.f32 %v1709_v18  ;;  %v1737_v29 = vmul.f32 1.442695, %v1735_v34 }
 0xee3   :  { %2391 = vpow2.f32 %v1739_v21 }
 0xee4   :  { %2393 = vpow2.f32 %v1737_v29 }
 0xeed   :  { %v2388_v22 = vpop.eup %2387 }
 0xeee   :  { %v1716_v17 = vmul.f32 1.0614054, %v2388_v22 }
 0xeef   :  { %v2390_v28 = vpop.eup %2389 }
 0xef0   :  { %v2039_v26 = vadd.f32 -1.4531521, %v1716_v17  ;;  %v1715_v46 = vmul.f32 1.0614054, %v2390_v28  ;;  %v2392_v20 = vpop.eup %2391 }
 0xef1   :  { %v2394_v52 = vpop.eup %2393 }
 0xef2   :  { %v1720_v43 = vmul.f32 %v2388_v22, %v2039_v26  ;;  %v2038_v59 = vadd.f32 -1.4531521, %v1715_v46 }
 0xef4   :  { %v1722_v61 = vadd.f32 1.4214138, %v1720_v43  ;;  %v1719_v30 = vmul.f32 %v2390_v28, %v2038_v59  ;;  %v1844_v59 = vld [vmem:[%s3068_s1 + $0x1c8] sm:$0x7] }
 0xef6   :  { %v1724_v63 = vmul.f32 %v2388_v22, %v1722_v61  ;;  %v1721_v25 = vadd.f32 1.4214138, %v1719_v30 }
 0xef8   :  { %v2041_v33 = vadd.f32 -0.28449672, %v1724_v63  ;;  %v1723_v35 = vmul.f32 %v2390_v28, %v1721_v25  ;;  %v1878_v63 = vrot.slane %v1844_v59, %v2603_v4 }
 0xefa   :  { %v1728_v40 = vmul.f32 %v2388_v22, %v2041_v33  ;;  %v2040_v19 = vadd.f32 -0.28449672, %v1723_v35 }
 0xefc   :  { %v1730_v41 = vadd.f32 0.2548296, %v1728_v40  ;;  %v1727_v44 = vmul.f32 %v2390_v28, %v2040_v19 }
 0xefe   :  { %v1732_v36 = vmul.f32 %v2388_v22, %v1730_v41  ;;  %v1729_v45 = vadd.f32 0.2548296, %v1727_v44  ;;  %v1884_v41 = vrot.slane %v1844_v59, %v2611_v6 }
 0xf00   :  { %v1742_v10 = vmul.f32 %v2392_v20, %v1732_v36  ;;  %v1731_v24 = vmul.f32 %v2390_v28, %v1729_v45  ;;  %v1894_v45 = vrot.slane %v1844_v59, %v2758_v55 }
 0xf02   :  { %v1744_v12 = vsub.f32 1.0, %v1742_v10  ;;  %v1741_v54 = vmul.f32 %v2394_v52, %v1731_v24 }
 0xf04   :  { %v1748_v56 = vsub.f32 0.0, %v1744_v12  ;;  %v1743_v5 = vsub.f32 1.0, %v1741_v54 }
 0xf06   :  { %v1750_v1 = vsel %vm1746_vm10, %v1744_v12, %v1748_v56  ;;  %v1747_v2 = vsub.f32 0.0, %v1743_v5 }
 0xf07   :  { %v1752_v38 = vadd.f32 1.0, %v1750_v1 }
 0xf08   :  { %v1749_v39 = vsel %vm1745_vm11, %v1743_v5, %v1747_v2 }
 0xf09   :  { %v1751_v47 = vadd.f32 1.0, %v1749_v39  ;;  %v1754_v51 = vmul.f32 %v1752_v38, %v1702_v49 }
 0xf0b   :  { %v1753_v50 = vmul.f32 %v1751_v47, %v1701_v48 }
 0xf0d   :  { %2329 = vmatprep.mubr.msk.f32.mxu1 %vm51_vm0, %v1753_v50 }
 0xf0e   :  { %2330 = vmatmul.mubr.msk.f32.vlgmr.msra.gmra.mxu1 %vm51_vm0, %v1754_v51 }
 0xfce   :  { %v2331_v57 = vpop.f32.mrf.mxu1 }
 0xfcf   :  { %v1837_v7 = vadd.f32 %v2331_v57, %v2963_v31  ;;  %v1889_v31 = vld [vmem:[%s3068_s1 + $0x1e0] sm:$0xff] }
 0xfd0   :  { %v1827_v60 = vpop.f32.mrf.mxu1  ;;  %2334 = vmatprep.subr.mxu0 %v1889_v31 }
 0xfd1   :  { %v1843_v0 = vadd.f32 %v1841_v62, %v1837_v7  ;;  %v1836_v9 = vadd.f32 %v1827_v60, %v2966_v15  ;;  %v1888_v15 = vld [vmem:[%s3068_s1 + $0x1d8] sm:$0xff]  ;;  %2335 = vmatpush3.msra.mxu0 %v1889_v31 }
 0xfd2   :  { %2336 = vmatprep.subr.mxu0 %v1888_v15 }
 0xfd3   :  { %v1842_v8 = vadd.f32 %v1841_v62, %v1836_v9  ;;  %v1848_v58 = vsel %vm159_vm2, %v1843_v0, 0.0  ;;  %v1854_v11 = vmul.f32 %v1843_v0, %v1843_v0  ;;  %2337 = vmatpush3.msra.mxu0 %v1888_v15 }
 0xfd4   :  { %1849 = vadd.xlane.f32.xlu1 %v1848_v58  ;;  %2338 = vmatprep.subr.mxu0 %v1887_v14 }
 0xfd5   :  { %v1845_v37 = vsel %vm155_vm1, %v1842_v8, 0.0  ;;  %v1853_v13 = vmul.f32 %v1842_v8, %v1842_v8  ;;  %v1858_v3 = vsel %vm159_vm2, %v1854_v11, 0.0  ;;  %2339 = vmatpush3.msra.mxu0 %v1887_v14 }
 0xfd6   :  { %1846 = vadd.xlane.f32.xlu0 %v1845_v37 }
 0xfd7   :  { %v1855_v42 = vsel %vm155_vm1, %v1853_v13, 0.0 }
 0xfd8   :  { %1859 = vadd.xlane.f32.xlu1 %v1858_v3 }
 0xfda   :  { %1856 = vadd.xlane.f32.xlu0 %v1855_v42 }
0x105d   :  { %v1850_v16 = vpop.xlane.xlu1 %1849 }
0x105e   :  { %v1852_v18 = vmul.f32 0.03125, %v1850_v16 }
0x105f   :  { %v1847_v23 = vpop.xlane.xlu0 %1846 }
0x1060   :  { %v1851_v53 = vmul.f32 0.03125, %v1847_v23  ;;  %v1864_v22 = vmul.f32 %v1852_v18, %v1852_v18  ;;  %v1868_v61 = vsub.f32 %v1843_v0, %v1852_v18 }
0x1061   :  { %v1860_v27 = vpop.xlane.xlu1 %1859 }
0x1062   :  { %v1862_v34 = vmul.f32 0.03125, %v1860_v27  ;;  %v1863_v21 = vmul.f32 %v1851_v53, %v1851_v53  ;;  %v1867_v25 = vsub.f32 %v1842_v8, %v1851_v53 }
0x1063   :  { %v1857_v17 = vpop.xlane.xlu0 %1856 }
0x1064   :  { %v1866_v28 = vsub.f32 %v1862_v34, %v1864_v22  ;;  %v1861_v26 = vmul.f32 0.03125, %v1857_v17 }
0x1066   :  { %v1870_v46 = vadd.f32 1e-12, %v1866_v28  ;;  %v1865_v29 = vsub.f32 %v1861_v26, %v1863_v21 }
0x1068   :  { %2395 = vrsqrt.f32 %v1870_v46  ;;  %v1869_v43 = vadd.f32 1e-12, %v1865_v29 }
0x106a   :  { %2397 = vrsqrt.f32 %v1869_v43 }
0x1075   :  { %v2396_v30 = vpop.eup %2395 }
0x1076   :  { %v1874_v33 = vmul.f32 %v2396_v30, %v1868_v61 }
0x1077   :  { %v2398_v35 = vpop.eup %2397 }
0x1078   :  { %v1873_v40 = vmul.f32 %v2398_v35, %v1867_v25  ;;  %v1880_v19 = vmul.f32 %v1878_v63, %v1874_v33 }
0x107a   :  { %v1879_v44 = vmul.f32 %v1878_v63, %v1873_v40  ;;  %v1886_v20 = vadd.f32 %v1884_v41, %v1880_v19 }
0x107c   :  { %v1885_v36 = vadd.f32 %v1884_v41, %v1879_v44 }
0x107e   :  { %2340 = vmatprep.mubr.msk.f32.mxu0 %vm155_vm1, %v1885_v36 }
0x107f   :  { %2341 = vmatmul.mubr.msk.f32.vlgmr.msra.gmra.mxu0 %vm155_vm1, %v1886_v20 }
0x113f   :  { %v2342_v10 = vpop.f32.mrf.mxu0 }
0x1140   :  { %v1973_v24 = vadd.f32 %v2342_v10, %v1894_v45 }
0x1141   :  { %v1967_v52 = vpop.f32.mrf.mxu0 }
0x1142   :  { %v1968_v4 = vadd.f32 %v1967_v52, %v1894_v45  ;;  %1980 = vrot.lane.b32.xlu0 %v1973_v24, %s2400_s29 }
0x1144   :  { %1978 = vrot.lane.b32.xlu1 %v1968_v4, %s2400_s29 }
0x11b4   :  { %v1981_v12 = vpop.permute.xlu0 %1980 }
0x11b5   :  { %v1985_v6 = vsel %vm155_vm1, %v1886_v20, %v1981_v12 }
0x11b6   :  { %v1988_v54 = vsel %vm1986_vm12, %v1985_v6, 0.0  ;;  %v1979_v56 = vpop.permute.xlu1 %1978 }
0x11b7   :  { %v1989_v5 = vsel %vm287_vm3, %v1988_v54, 0.0  ;;  %v1984_v1 = vsel %vm155_vm1, %v1885_v36, %v1979_v56 }
0x11b8   :  { %1991 = vst [vmem:[%s3071_s3 + $0x8] sm:$0xff] %v1989_v5  ;;  %v1987_v55 = vsel %vm1986_vm12, %v1984_v1, 0.0 }
0x11b9   :  { %1990 = vst [vmem:[%s3071_s3] sm:$0xff] %v1987_v55 }

</bundles_post_ra>
